<compile_context>
chip_gen: v7x
topology: tpu7x:2x2x1
jax: 0.10.0
libtpu: 0.0.40
codegen_flags: <defaults>
</compile_context>

<pallas_src>
import functools

import jax
import jax.numpy as jnp
from jax.experimental import pallas as pl
from jax.experimental.pallas import tpu as pltpu


# ---------------------------------------------------------------------------
# Pallas 3x3 / stride-1 / pad-1 convolution (bias=False), NCHW in, NCHW out.
# ---------------------------------------------------------------------------

def _conv3x3_kernel(w_ref, x_ref, o_ref, *, nb, wp, q):
    # w_ref: [c_out, 9*c_in] bf16   (resident in VMEM every grid step)
    # x_ref: [nb, c_in, P]   bf16   (row-padded images flattened row-major, row stride wp)
    # o_ref: [nb, c_out, q]  bf16   (q = H*wp; the 2 garbage cols/row are dropped later)
    w = w_ref[...]                                            # load weights once per step
    offsets = [ky * wp + kx for ky in range(3) for kx in range(3)]
    for i in range(nb):                 # nb <= 8 -> small static unroll, 1 matmul / image
        xi = x_ref[i]                                         # one [c_in, P] load / image
        # Stack the 9 lane-shifted views into a single K = 9*c_in operand (fused im2col
        # in registers/VMEM), then a single MXU matmul with f32 accumulation.
        taps = jnp.concatenate([xi[:, d:d + q] for d in offsets], axis=0)   # [9*c_in, q]
        acc = jnp.dot(w, taps, preferred_element_type=jnp.float32)          # [c_out, q]
        o_ref[i] = acc.astype(o_ref.dtype)                    # bf16 store, lane-dense


def _tpu_vmem_capacity_bytes():
    # Best-effort trace-time query; fall back to the smallest current part (v7x: 64 MiB).
    try:
        cap = getattr(pltpu.get_tpu_info(), "vmem_capacity_bytes", None)
        if cap:
            return int(cap)
    except Exception:
        pass
    return 64 * 2**20


def _pick_images_per_block(batch, bytes_per_image, budget, max_images=8):
    """Largest divisor of `batch` whose double-buffered block fits the VMEM budget."""
    cap = int(max(1, min(max_images, budget // (2 * bytes_per_image), batch)))
    divisors = [d for d in range(1, cap + 1) if batch % d == 0]
    best = max(divisors)
    # Keep >= 2 grid steps when it costs at most 2x in block size, so dual-TensorCore
    # parts (v7x) can split the "parallel" grid axis across cores.
    multi = [d for d in divisors if batch // d >= 2]
    if multi and 2 * max(multi) >= best:
        best = max(multi)
    return best


def conv3x3_pallas(x_nchw, weight):
    """3x3 conv, stride 1, pad 1, no bias.  x: [B, C, H, W] f32, weight: [c_out, C, 3, 3].

    Returns bf16 [B, c_out, H, W] (f32 accumulation inside the kernel).
    """
    B, C, H, W = x_nchw.shape
    c_out, c_in, kh, kw = weight.shape
    # TODO(synk): only the 3x3 / stride-1 / pad-1 configuration of the module is implemented.
    assert (kh, kw) == (3, 3) and c_in == C
    wp = W + 2                      # padded row stride
    q = H * wp                      # flat output length per image (2 garbage cols / row)
    P = (H + 3) * wp                # rows padded (1 top, 2 bottom): all 9 taps in bounds

    # Single fused cast+pad pass; the HxW flatten of contiguous dims is free.
    xf = jnp.pad(x_nchw.astype(jnp.bfloat16),
                 ((0, 0), (0, 0), (1, 2), (1, 1))).reshape(B, C, P)

    # weight OIHW -> [c_out, 9*C] with column index (ky*3+kx)*C + c (matches tap stacking).
    w_mat = jnp.transpose(weight, (0, 2, 3, 1)).reshape(c_out, 9 * C).astype(jnp.bfloat16)

    cap = _tpu_vmem_capacity_bytes()
    budget = min(cap // 4, 32 * 2**20)          # ~16 MiB on v7x, 32 MiB on v5e/v6e
    bytes_per_image = C * P * 2 + c_out * q * 2  # bf16 in + bf16 out
    nb = _pick_images_per_block(B, bytes_per_image, budget)
    grid = (B // nb,)

    # TODO(synk): for very large 9*C add a channel grid axis ("arbitrary") with a VMEM
    # scratch f32 accumulator instead of full-C blocks (matters under v7x's 64 MiB VMEM).
    kernel = functools.partial(_conv3x3_kernel, nb=nb, wp=wp, q=q)
    out_flat = pl.pallas_call(
        kernel,
        out_shape=jax.ShapeDtypeStruct((B, c_out, q), jnp.bfloat16),
        grid_spec=pltpu.PrefetchScalarGridSpec(
            num_scalar_prefetch=0,
            grid=grid,
            in_specs=[
                pl.BlockSpec((c_out, 9 * C), lambda i: (0, 0)),   # weights resident
                pl.BlockSpec((nb, C, P), lambda i: (i, 0, 0)),    # nb images per step
            ],
            out_specs=pl.BlockSpec((nb, c_out, q), lambda i: (i, 0, 0)),
        ),
        compiler_params=pltpu.CompilerParams(
            dimension_semantics=("parallel",),
            vmem_limit_bytes=min(cap // 2, 96 * 1024 * 1024),
        ),
    )(w_mat, xf)

    # [B, c_out, H*(W+2)] -> [B, c_out, H, W+2] (free reshape) -> drop 2 pad columns/row.
    return out_flat.reshape(B, c_out, H, wp)[:, :, :, :W]


# ---------------------------------------------------------------------------
# Temporal shift (shift_unit) + module forward.
# ---------------------------------------------------------------------------

def _shift_unit(xv, fold, skip, shift_type):
    # xv: [n_batch, T, C, H, W] (f32)
    T, c = xv.shape[1], xv.shape[2]
    first, mid, last = xv[:, :, :fold], xv[:, :, fold:c - fold], xv[:, :, c - fold:]
    zf = jnp.zeros_like(first[:, :skip])
    zl = jnp.zeros_like(last[:, :skip])
    if shift_type == "bi_direction":
        first_s = jnp.concatenate([first[:, skip:], zf], axis=1)      # out[t] = x[t+skip]
        last_s = jnp.concatenate([zl, last[:, :T - skip]], axis=1)    # out[t] = x[t-skip]
    elif shift_type == "uni_direction":
        first_s = jnp.concatenate([zf, first[:, :T - skip]], axis=1)
        last_s = jnp.concatenate([zl, last[:, :T - skip]], axis=1)
    else:
        raise KeyError(f"shift_type must be uni_direction/bi_direction, got {shift_type}")
    return jnp.concatenate([first_s, mid, last_s], axis=2)


def basic_conv2d_mtsres_forward(info, weight, *, n_segment, n_div, skip_times,
                                shift_type="bi_direction"):
    x, seqL, dim = info
    # TODO(synk): variable-length path (seqL is not None) needs host-side lengths; only
    # the fixed-length (seqL=None) path is implemented.
    assert seqL is None, "only the fixed-length (seqL=None) path is implemented"
    nt, c, h, w = x.shape
    assert nt % n_segment == 0
    n_batch = nt // n_segment
    fold = c // n_div
    assert fold >= 1 and all(0 < s < n_segment for s in skip_times)

    # Bias-free conv is linear:  conv(x) + sum_k conv(shift_k(x)) == conv(x + sum_k shift_k(x)).
    # Sum the branches on the INPUT (in f32) and run a single conv over nt images.
    xv = x.reshape(n_batch, n_segment, c, h, w)
    xsum = x
    for s in skip_times:
        xsum = xsum + _shift_unit(xv, fold, s, shift_type).reshape(nt, c, h, w)

    # Note: output is bf16 (f32 accumulation inside the kernel) to halve HBM writeback.
    y = conv3x3_pallas(xsum, weight)
    return y, seqL, dim


# ---------------------------------------------------------------------------
# Demo + correctness check.
# ---------------------------------------------------------------------------

if __name__ == "__main__":
    key = jax.random.PRNGKey(0)
    k_x, k_w = jax.random.split(key)

    n_batch, n_segment = 2, 8
    c_in, c_out, h, w = 4, 8, 16, 16
    n_div, skip_times, shift_type = 4, [1, 2], "bi_direction"
    nt = n_batch * n_segment

    x = jax.random.normal(k_x, (nt, c_in, h, w), dtype=jnp.float32)
    weight = 0.1 * jax.random.normal(k_w, (c_out, c_in, 3, 3), dtype=jnp.float32)

    fwd = jax.jit(functools.partial(
        basic_conv2d_mtsres_forward, n_segment=n_segment, n_div=n_div,
        skip_times=skip_times, shift_type=shift_type))
    y, _, _ = fwd((x, None, 1), weight)
    y = jax.block_until_ready(y)
    assert y.shape == (nt, c_out, h, w), y.shape

    # Reference: direct f32 transcription of the torch module (per-branch convs summed).
    fold = c_in // n_div

    def ref_shift(x_, skip):
        xv = x_.reshape(n_batch, n_segment, c_in, h, w)
        out = jnp.zeros_like(xv)
        if shift_type == "bi_direction":
            out = out.at[:, :n_segment - skip, :fold].set(xv[:, skip:, :fold])
            out = out.at[:, skip:, c_in - fold:].set(xv[:, :n_segment - skip, c_in - fold:])
        else:
            out = out.at[:, skip:, :fold].set(xv[:, :n_segment - skip, :fold])
            out = out.at[:, skip:, c_in - fold:].set(xv[:, :n_segment - skip, c_in - fold:])
        out = out.at[:, :, fold:c_in - fold].set(xv[:, :, fold:c_in - fold])
        return out.reshape(nt, c_in, h, w)

    def ref_conv(x_):
        return jax.lax.conv_general_dilated(
            x_, weight, window_strides=(1, 1), padding=((1, 1), (1, 1)),
            dimension_numbers=("NCHW", "OIHW", "NCHW"),
            precision=jax.lax.Precision.HIGHEST)

    ref = ref_conv(x)
    for s in skip_times:
        ref = ref + ref_conv(ref_shift(x, s))
    ref = jax.block_until_ready(ref)

    y32 = y.astype(jnp.float32)
    max_err = float(jnp.max(jnp.abs(y32 - ref)))
    assert jnp.allclose(y32, ref, rtol=3e-2, atol=3e-2), f"mismatch, max |err| = {max_err}"
    print("KERNEL_OK")
</pallas_src>

<mosaic_0001>
module attributes {stable_mosaic.version = 11 : i64} {
  func.func @_conv3x3_kernel(%arg0: i32, %arg1: memref<8x36xbf16, #tpu.memory_space<vmem>>, %arg2: memref<8x4x342xbf16, #tpu.memory_space<vmem>>, %arg3: memref<8x8x288xbf16, #tpu.memory_space<vmem>>) attributes {dimension_semantics = [#tpu.dimension_semantics<parallel>], iteration_bounds = array<i64: 2>, scalar_prefetch = 0 : i64, scratch_operands = 0 : i64, tpu.core_type = #tpu.core_type<tc>, window_params = [{pipeline_mode = #tpu.pipeline_mode<synchronous>, transform_indices = @transform_0, window_bounds = array<i64: 8, 36>}, {transform_indices = @transform_1, window_bounds = array<i64: 8, 4, 342>}, {transform_indices = @transform_2, window_bounds = array<i64: 8, 8, 288>}]} {
    %c0 = arith.constant 0 : index
    %c0_0 = arith.constant 0 : index
    %0 = vector.load %arg1[%c0, %c0_0] : memref<8x36xbf16, #tpu.memory_space<vmem>>, vector<8x36xbf16>
    %c0_1 = arith.constant 0 : index
    %c0_2 = arith.constant 0 : index
    %c0_3 = arith.constant 0 : index
    %1 = vector.load %arg2[%c0_1, %c0_2, %c0_3] : memref<8x4x342xbf16, #tpu.memory_space<vmem>>, vector<1x4x342xbf16>
    %2 = vector.shape_cast %1 : vector<1x4x342xbf16> to vector<4x342xbf16>
    %3 = vector.extract_strided_slice %2 {offsets = [0, 0], sizes = [4, 288], strides = [1, 1]} : vector<4x342xbf16> to vector<4x288xbf16>
    %4 = vector.extract_strided_slice %2 {offsets = [0, 1], sizes = [4, 288], strides = [1, 1]} : vector<4x342xbf16> to vector<4x288xbf16>
    %5 = vector.extract_strided_slice %2 {offsets = [0, 2], sizes = [4, 288], strides = [1, 1]} : vector<4x342xbf16> to vector<4x288xbf16>
    %6 = vector.extract_strided_slice %2 {offsets = [0, 18], sizes = [4, 288], strides = [1, 1]} : vector<4x342xbf16> to vector<4x288xbf16>
    %7 = vector.extract_strided_slice %2 {offsets = [0, 19], sizes = [4, 288], strides = [1, 1]} : vector<4x342xbf16> to vector<4x288xbf16>
    %8 = vector.extract_strided_slice %2 {offsets = [0, 20], sizes = [4, 288], strides = [1, 1]} : vector<4x342xbf16> to vector<4x288xbf16>
    %9 = vector.extract_strided_slice %2 {offsets = [0, 36], sizes = [4, 288], strides = [1, 1]} : vector<4x342xbf16> to vector<4x288xbf16>
    %10 = vector.extract_strided_slice %2 {offsets = [0, 37], sizes = [4, 288], strides = [1, 1]} : vector<4x342xbf16> to vector<4x288xbf16>
    %11 = vector.extract_strided_slice %2 {offsets = [0, 38], sizes = [4, 288], strides = [1, 1]} : vector<4x342xbf16> to vector<4x288xbf16>
    %12 = tpu.concatenate %3, %4, %5, %6, %7, %8, %9, %10, %11 in 0 : vector<4x288xbf16>, vector<4x288xbf16>, vector<4x288xbf16>, vector<4x288xbf16>, vector<4x288xbf16>, vector<4x288xbf16>, vector<4x288xbf16>, vector<4x288xbf16>, vector<4x288xbf16> -> vector<36x288xbf16>
    %cst = arith.constant dense<0.000000e+00> : vector<8x288xf32>
    %13 = tpu.matmul %0, %12, %cst {dimension_numbers = #tpu.dot_dimension_numbers<[1], [0], [0], [1], [0, 0, 1, 1], [], []>} : vector<8x36xbf16>, vector<36x288xbf16>, vector<8x288xf32> -> vector<8x288xf32>
    %14 = arith.truncf %13 : vector<8x288xf32> to vector<8x288xbf16>
    %c0_4 = arith.constant 0 : index
    %c0_5 = arith.constant 0 : index
    %c0_6 = arith.constant 0 : index
    %15 = vector.load %arg3[%c0_4, %c0_5, %c0_6] : memref<8x8x288xbf16, #tpu.memory_space<vmem>>, vector<1x8x288xbf16>
    %16 = vector.shape_cast %15 : vector<1x8x288xbf16> to vector<8x288xbf16>
    %17 = vector.shape_cast %14 : vector<8x288xbf16> to vector<1x8x288xbf16>
    tpu.vector_store %arg3[%c0_4, %c0_5, %c0_6], %17 {strides = array<i32>} : memref<8x8x288xbf16, #tpu.memory_space<vmem>>, vector<1x8x288xbf16>,
    %c1 = arith.constant 1 : index
    %c0_7 = arith.constant 0 : index
    %c0_8 = arith.constant 0 : index
    %18 = vector.load %arg2[%c1, %c0_7, %c0_8] : memref<8x4x342xbf16, #tpu.memory_space<vmem>>, vector<1x4x342xbf16>
    %19 = vector.shape_cast %18 : vector<1x4x342xbf16> to vector<4x342xbf16>
    %20 = vector.extract_strided_slice %19 {offsets = [0, 0], sizes = [4, 288], strides = [1, 1]} : vector<4x342xbf16> to vector<4x288xbf16>
    %21 = vector.extract_strided_slice %19 {offsets = [0, 1], sizes = [4, 288], strides = [1, 1]} : vector<4x342xbf16> to vector<4x288xbf16>
    %22 = vector.extract_strided_slice %19 {offsets = [0, 2], sizes = [4, 288], strides = [1, 1]} : vector<4x342xbf16> to vector<4x288xbf16>
    %23 = vector.extract_strided_slice %19 {offsets = [0, 18], sizes = [4, 288], strides = [1, 1]} : vector<4x342xbf16> to vector<4x288xbf16>
    %24 = vector.extract_strided_slice %19 {offsets = [0, 19], sizes = [4, 288], strides = [1, 1]} : vector<4x342xbf16> to vector<4x288xbf16>
    %25 = vector.extract_strided_slice %19 {offsets = [0, 20], sizes = [4, 288], strides = [1, 1]} : vector<4x342xbf16> to vector<4x288xbf16>
    %26 = vector.extract_strided_slice %19 {offsets = [0, 36], sizes = [4, 288], strides = [1, 1]} : vector<4x342xbf16> to vector<4x288xbf16>
    %27 = vector.extract_strided_slice %19 {offsets = [0, 37], sizes = [4, 288], strides = [1, 1]} : vector<4x342xbf16> to vector<4x288xbf16>
    %28 = vector.extract_strided_slice %19 {offsets = [0, 38], sizes = [4, 288], strides = [1, 1]} : vector<4x342xbf16> to vector<4x288xbf16>
    %29 = tpu.concatenate %20, %21, %22, %23, %24, %25, %26, %27, %28 in 0 : vector<4x288xbf16>, vector<4x288xbf16>, vector<4x288xbf16>, vector<4x288xbf16>, vector<4x288xbf16>, vector<4x288xbf16>, vector<4x288xbf16>, vector<4x288xbf16>, vector<4x288xbf16> -> vector<36x288xbf16>
    %cst_9 = arith.constant dense<0.000000e+00> : vector<8x288xf32>
    %30 = tpu.matmul %0, %29, %cst_9 {dimension_numbers = #tpu.dot_dimension_numbers<[1], [0], [0], [1], [0, 0, 1, 1], [], []>} : vector<8x36xbf16>, vector<36x288xbf16>, vector<8x288xf32> -> vector<8x288xf32>
    %31 = arith.truncf %30 : vector<8x288xf32> to vector<8x288xbf16>
    %c1_10 = arith.constant 1 : index
    %c0_11 = arith.constant 0 : index
    %c0_12 = arith.constant 0 : index
    %32 = vector.load %arg3[%c1_10, %c0_11, %c0_12] : memref<8x8x288xbf16, #tpu.memory_space<vmem>>, vector<1x8x288xbf16>
    %33 = vector.shape_cast %32 : vector<1x8x288xbf16> to vector<8x288xbf16>
    %34 = vector.shape_cast %31 : vector<8x288xbf16> to vector<1x8x288xbf16>
    tpu.vector_store %arg3[%c1_10, %c0_11, %c0_12], %34 {strides = array<i32>} : memref<8x8x288xbf16, #tpu.memory_space<vmem>>, vector<1x8x288xbf16>,
    %c2 = arith.constant 2 : index
    %c0_13 = arith.constant 0 : index
    %c0_14 = arith.constant 0 : index
    %35 = vector.load %arg2[%c2, %c0_13, %c0_14] : memref<8x4x342xbf16, #tpu.memory_space<vmem>>, vector<1x4x342xbf16>
    %36 = vector.shape_cast %35 : vector<1x4x342xbf16> to vector<4x342xbf16>
    %37 = vector.extract_strided_slice %36 {offsets = [0, 0], sizes = [4, 288], strides = [1, 1]} : vector<4x342xbf16> to vector<4x288xbf16>
    %38 = vector.extract_strided_slice %36 {offsets = [0, 1], sizes = [4, 288], strides = [1, 1]} : vector<4x342xbf16> to vector<4x288xbf16>
    %39 = vector.extract_strided_slice %36 {offsets = [0, 2], sizes = [4, 288], strides = [1, 1]} : vector<4x342xbf16> to vector<4x288xbf16>
    %40 = vector.extract_strided_slice %36 {offsets = [0, 18], sizes = [4, 288], strides = [1, 1]} : vector<4x342xbf16> to vector<4x288xbf16>
    %41 = vector.extract_strided_slice %36 {offsets = [0, 19], sizes = [4, 288], strides = [1, 1]} : vector<4x342xbf16> to vector<4x288xbf16>
    %42 = vector.extract_strided_slice %36 {offsets = [0, 20], sizes = [4, 288], strides = [1, 1]} : vector<4x342xbf16> to vector<4x288xbf16>
    %43 = vector.extract_strided_slice %36 {offsets = [0, 36], sizes = [4, 288], strides = [1, 1]} : vector<4x342xbf16> to vector<4x288xbf16>
    %44 = vector.extract_strided_slice %36 {offsets = [0, 37], sizes = [4, 288], strides = [1, 1]} : vector<4x342xbf16> to vector<4x288xbf16>
    %45 = vector.extract_strided_slice %36 {offsets = [0, 38], sizes = [4, 288], strides = [1, 1]} : vector<4x342xbf16> to vector<4x288xbf16>
    %46 = tpu.concatenate %37, %38, %39, %40, %41, %42, %43, %44, %45 in 0 : vector<4x288xbf16>, vector<4x288xbf16>, vector<4x288xbf16>, vector<4x288xbf16>, vector<4x288xbf16>, vector<4x288xbf16>, vector<4x288xbf16>, vector<4x288xbf16>, vector<4x288xbf16> -> vector<36x288xbf16>
    %cst_15 = arith.constant dense<0.000000e+00> : vector<8x288xf32>
    %47 = tpu.matmul %0, %46, %cst_15 {dimension_numbers = #tpu.dot_dimension_numbers<[1], [0], [0], [1], [0, 0, 1, 1], [], []>} : vector<8x36xbf16>, vector<36x288xbf16>, vector<8x288xf32> -> vector<8x288xf32>
    %48 = arith.truncf %47 : vector<8x288xf32> to vector<8x288xbf16>
    %c2_16 = arith.constant 2 : index
    %c0_17 = arith.constant 0 : index
    %c0_18 = arith.constant 0 : index
    %49 = vector.load %arg3[%c2_16, %c0_17, %c0_18] : memref<8x8x288xbf16, #tpu.memory_space<vmem>>, vector<1x8x288xbf16>
    %50 = vector.shape_cast %49 : vector<1x8x288xbf16> to vector<8x288xbf16>
    %51 = vector.shape_cast %48 : vector<8x288xbf16> to vector<1x8x288xbf16>
    tpu.vector_store %arg3[%c2_16, %c0_17, %c0_18], %51 {strides = array<i32>} : memref<8x8x288xbf16, #tpu.memory_space<vmem>>, vector<1x8x288xbf16>,
    %c3 = arith.constant 3 : index
    %c0_19 = arith.constant 0 : index
    %c0_20 = arith.constant 0 : index
    %52 = vector.load %arg2[%c3, %c0_19, %c0_20] : memref<8x4x342xbf16, #tpu.memory_space<vmem>>, vector<1x4x342xbf16>
    %53 = vector.shape_cast %52 : vector<1x4x342xbf16> to vector<4x342xbf16>
    %54 = vector.extract_strided_slice %53 {offsets = [0, 0], sizes = [4, 288], strides = [1, 1]} : vector<4x342xbf16> to vector<4x288xbf16>
    %55 = vector.extract_strided_slice %53 {offsets = [0, 1], sizes = [4, 288], strides = [1, 1]} : vector<4x342xbf16> to vector<4x288xbf16>
    %56 = vector.extract_strided_slice %53 {offsets = [0, 2], sizes = [4, 288], strides = [1, 1]} : vector<4x342xbf16> to vector<4x288xbf16>
    %57 = vector.extract_strided_slice %53 {offsets = [0, 18], sizes = [4, 288], strides = [1, 1]} : vector<4x342xbf16> to vector<4x288xbf16>
    %58 = vector.extract_strided_slice %53 {offsets = [0, 19], sizes = [4, 288], strides = [1, 1]} : vector<4x342xbf16> to vector<4x288xbf16>
    %59 = vector.extract_strided_slice %53 {offsets = [0, 20], sizes = [4, 288], strides = [1, 1]} : vector<4x342xbf16> to vector<4x288xbf16>
    %60 = vector.extract_strided_slice %53 {offsets = [0, 36], sizes = [4, 288], strides = [1, 1]} : vector<4x342xbf16> to vector<4x288xbf16>
    %61 = vector.extract_strided_slice %53 {offsets = [0, 37], sizes = [4, 288], strides = [1, 1]} : vector<4x342xbf16> to vector<4x288xbf16>
    %62 = vector.extract_strided_slice %53 {offsets = [0, 38], sizes = [4, 288], strides = [1, 1]} : vector<4x342xbf16> to vector<4x288xbf16>
    %63 = tpu.concatenate %54, %55, %56, %57, %58, %59, %60, %61, %62 in 0 : vector<4x288xbf16>, vector<4x288xbf16>, vector<4x288xbf16>, vector<4x288xbf16>, vector<4x288xbf16>, vector<4x288xbf16>, vector<4x288xbf16>, vector<4x288xbf16>, vector<4x288xbf16> -> vector<36x288xbf16>
    %cst_21 = arith.constant dense<0.000000e+00> : vector<8x288xf32>
    %64 = tpu.matmul %0, %63, %cst_21 {dimension_numbers = #tpu.dot_dimension_numbers<[1], [0], [0], [1], [0, 0, 1, 1], [], []>} : vector<8x36xbf16>, vector<36x288xbf16>, vector<8x288xf32> -> vector<8x288xf32>
    %65 = arith.truncf %64 : vector<8x288xf32> to vector<8x288xbf16>
    %c3_22 = arith.constant 3 : index
    %c0_23 = arith.constant 0 : index
    %c0_24 = arith.constant 0 : index
    %66 = vector.load %arg3[%c3_22, %c0_23, %c0_24] : memref<8x8x288xbf16, #tpu.memory_space<vmem>>, vector<1x8x288xbf16>
    %67 = vector.shape_cast %66 : vector<1x8x288xbf16> to vector<8x288xbf16>
    %68 = vector.shape_cast %65 : vector<8x288xbf16> to vector<1x8x288xbf16>
    tpu.vector_store %arg3[%c3_22, %c0_23, %c0_24], %68 {strides = array<i32>} : memref<8x8x288xbf16, #tpu.memory_space<vmem>>, vector<1x8x288xbf16>,
    %c4 = arith.constant 4 : index
    %c0_25 = arith.constant 0 : index
    %c0_26 = arith.constant 0 : index
    %69 = vector.load %arg2[%c4, %c0_25, %c0_26] : memref<8x4x342xbf16, #tpu.memory_space<vmem>>, vector<1x4x342xbf16>
    %70 = vector.shape_cast %69 : vector<1x4x342xbf16> to vector<4x342xbf16>
    %71 = vector.extract_strided_slice %70 {offsets = [0, 0], sizes = [4, 288], strides = [1, 1]} : vector<4x342xbf16> to vector<4x288xbf16>
    %72 = vector.extract_strided_slice %70 {offsets = [0, 1], sizes = [4, 288], strides = [1, 1]} : vector<4x342xbf16> to vector<4x288xbf16>
    %73 = vector.extract_strided_slice %70 {offsets = [0, 2], sizes = [4, 288], strides = [1, 1]} : vector<4x342xbf16> to vector<4x288xbf16>
    %74 = vector.extract_strided_slice %70 {offsets = [0, 18], sizes = [4, 288], strides = [1, 1]} : vector<4x342xbf16> to vector<4x288xbf16>
    %75 = vector.extract_strided_slice %70 {offsets = [0, 19], sizes = [4, 288], strides = [1, 1]} : vector<4x342xbf16> to vector<4x288xbf16>
    %76 = vector.extract_strided_slice %70 {offsets = [0, 20], sizes = [4, 288], strides = [1, 1]} : vector<4x342xbf16> to vector<4x288xbf16>
    %77 = vector.extract_strided_slice %70 {offsets = [0, 36], sizes = [4, 288], strides = [1, 1]} : vector<4x342xbf16> to vector<4x288xbf16>
    %78 = vector.extract_strided_slice %70 {offsets = [0, 37], sizes = [4, 288], strides = [1, 1]} : vector<4x342xbf16> to vector<4x288xbf16>
    %79 = vector.extract_strided_slice %70 {offsets = [0, 38], sizes = [4, 288], strides = [1, 1]} : vector<4x342xbf16> to vector<4x288xbf16>
    %80 = tpu.concatenate %71, %72, %73, %74, %75, %76, %77, %78, %79 in 0 : vector<4x288xbf16>, vector<4x288xbf16>, vector<4x288xbf16>, vector<4x288xbf16>, vector<4x288xbf16>, vector<4x288xbf16>, vector<4x288xbf16>, vector<4x288xbf16>, vector<4x288xbf16> -> vector<36x288xbf16>
    %cst_27 = arith.constant dense<0.000000e+00> : vector<8x288xf32>
    %81 = tpu.matmul %0, %80, %cst_27 {dimension_numbers = #tpu.dot_dimension_numbers<[1], [0], [0], [1], [0, 0, 1, 1], [], []>} : vector<8x36xbf16>, vector<36x288xbf16>, vector<8x288xf32> -> vector<8x288xf32>
    %82 = arith.truncf %81 : vector<8x288xf32> to vector<8x288xbf16>
    %c4_28 = arith.constant 4 : index
    %c0_29 = arith.constant 0 : index
    %c0_30 = arith.constant 0 : index
    %83 = vector.load %arg3[%c4_28, %c0_29, %c0_30] : memref<8x8x288xbf16, #tpu.memory_space<vmem>>, vector<1x8x288xbf16>
    %84 = vector.shape_cast %83 : vector<1x8x288xbf16> to vector<8x288xbf16>
    %85 = vector.shape_cast %82 : vector<8x288xbf16> to vector<1x8x288xbf16>
    tpu.vector_store %arg3[%c4_28, %c0_29, %c0_30], %85 {strides = array<i32>} : memref<8x8x288xbf16, #tpu.memory_space<vmem>>, vector<1x8x288xbf16>,
    %c5 = arith.constant 5 : index
    %c0_31 = arith.constant 0 : index
    %c0_32 = arith.constant 0 : index
    %86 = vector.load %arg2[%c5, %c0_31, %c0_32] : memref<8x4x342xbf16, #tpu.memory_space<vmem>>, vector<1x4x342xbf16>
    %87 = vector.shape_cast %86 : vector<1x4x342xbf16> to vector<4x342xbf16>
    %88 = vector.extract_strided_slice %87 {offsets = [0, 0], sizes = [4, 288], strides = [1, 1]} : vector<4x342xbf16> to vector<4x288xbf16>
    %89 = vector.extract_strided_slice %87 {offsets = [0, 1], sizes = [4, 288], strides = [1, 1]} : vector<4x342xbf16> to vector<4x288xbf16>
    %90 = vector.extract_strided_slice %87 {offsets = [0, 2], sizes = [4, 288], strides = [1, 1]} : vector<4x342xbf16> to vector<4x288xbf16>
    %91 = vector.extract_strided_slice %87 {offsets = [0, 18], sizes = [4, 288], strides = [1, 1]} : vector<4x342xbf16> to vector<4x288xbf16>
    %92 = vector.extract_strided_slice %87 {offsets = [0, 19], sizes = [4, 288], strides = [1, 1]} : vector<4x342xbf16> to vector<4x288xbf16>
    %93 = vector.extract_strided_slice %87 {offsets = [0, 20], sizes = [4, 288], strides = [1, 1]} : vector<4x342xbf16> to vector<4x288xbf16>
    %94 = vector.extract_strided_slice %87 {offsets = [0, 36], sizes = [4, 288], strides = [1, 1]} : vector<4x342xbf16> to vector<4x288xbf16>
    %95 = vector.extract_strided_slice %87 {offsets = [0, 37], sizes = [4, 288], strides = [1, 1]} : vector<4x342xbf16> to vector<4x288xbf16>
    %96 = vector.extract_strided_slice %87 {offsets = [0, 38], sizes = [4, 288], strides = [1, 1]} : vector<4x342xbf16> to vector<4x288xbf16>
    %97 = tpu.concatenate %88, %89, %90, %91, %92, %93, %94, %95, %96 in 0 : vector<4x288xbf16>, vector<4x288xbf16>, vector<4x288xbf16>, vector<4x288xbf16>, vector<4x288xbf16>, vector<4x288xbf16>, vector<4x288xbf16>, vector<4x288xbf16>, vector<4x288xbf16> -> vector<36x288xbf16>
    %cst_33 = arith.constant dense<0.000000e+00> : vector<8x288xf32>
    %98 = tpu.matmul %0, %97, %cst_33 {dimension_numbers = #tpu.dot_dimension_numbers<[1], [0], [0], [1], [0, 0, 1, 1], [], []>} : vector<8x36xbf16>, vector<36x288xbf16>, vector<8x288xf32> -> vector<8x288xf32>
    %99 = arith.truncf %98 : vector<8x288xf32> to vector<8x288xbf16>
    %c5_34 = arith.constant 5 : index
    %c0_35 = arith.constant 0 : index
    %c0_36 = arith.constant 0 : index
    %100 = vector.load %arg3[%c5_34, %c0_35, %c0_36] : memref<8x8x288xbf16, #tpu.memory_space<vmem>>, vector<1x8x288xbf16>
    %101 = vector.shape_cast %100 : vector<1x8x288xbf16> to vector<8x288xbf16>
    %102 = vector.shape_cast %99 : vector<8x288xbf16> to vector<1x8x288xbf16>
    tpu.vector_store %arg3[%c5_34, %c0_35, %c0_36], %102 {strides = array<i32>} : memref<8x8x288xbf16, #tpu.memory_space<vmem>>, vector<1x8x288xbf16>,
    %c6 = arith.constant 6 : index
    %c0_37 = arith.constant 0 : index
    %c0_38 = arith.constant 0 : index
    %103 = vector.load %arg2[%c6, %c0_37, %c0_38] : memref<8x4x342xbf16, #tpu.memory_space<vmem>>, vector<1x4x342xbf16>
    %104 = vector.shape_cast %103 : vector<1x4x342xbf16> to vector<4x342xbf16>
    %105 = vector.extract_strided_slice %104 {offsets = [0, 0], sizes = [4, 288], strides = [1, 1]} : vector<4x342xbf16> to vector<4x288xbf16>
    %106 = vector.extract_strided_slice %104 {offsets = [0, 1], sizes = [4, 288], strides = [1, 1]} : vector<4x342xbf16> to vector<4x288xbf16>
    %107 = vector.extract_strided_slice %104 {offsets = [0, 2], sizes = [4, 288], strides = [1, 1]} : vector<4x342xbf16> to vector<4x288xbf16>
    %108 = vector.extract_strided_slice %104 {offsets = [0, 18], sizes = [4, 288], strides = [1, 1]} : vector<4x342xbf16> to vector<4x288xbf16>
    %109 = vector.extract_strided_slice %104 {offsets = [0, 19], sizes = [4, 288], strides = [1, 1]} : vector<4x342xbf16> to vector<4x288xbf16>
    %110 = vector.extract_strided_slice %104 {offsets = [0, 20], sizes = [4, 288], strides = [1, 1]} : vector<4x342xbf16> to vector<4x288xbf16>
    %111 = vector.extract_strided_slice %104 {offsets = [0, 36], sizes = [4, 288], strides = [1, 1]} : vector<4x342xbf16> to vector<4x288xbf16>
    %112 = vector.extract_strided_slice %104 {offsets = [0, 37], sizes = [4, 288], strides = [1, 1]} : vector<4x342xbf16> to vector<4x288xbf16>
    %113 = vector.extract_strided_slice %104 {offsets = [0, 38], sizes = [4, 288], strides = [1, 1]} : vector<4x342xbf16> to vector<4x288xbf16>
    %114 = tpu.concatenate %105, %106, %107, %108, %109, %110, %111, %112, %113 in 0 : vector<4x288xbf16>, vector<4x288xbf16>, vector<4x288xbf16>, vector<4x288xbf16>, vector<4x288xbf16>, vector<4x288xbf16>, vector<4x288xbf16>, vector<4x288xbf16>, vector<4x288xbf16> -> vector<36x288xbf16>
    %cst_39 = arith.constant dense<0.000000e+00> : vector<8x288xf32>
    %115 = tpu.matmul %0, %114, %cst_39 {dimension_numbers = #tpu.dot_dimension_numbers<[1], [0], [0], [1], [0, 0, 1, 1], [], []>} : vector<8x36xbf16>, vector<36x288xbf16>, vector<8x288xf32> -> vector<8x288xf32>
    %116 = arith.truncf %115 : vector<8x288xf32> to vector<8x288xbf16>
    %c6_40 = arith.constant 6 : index
    %c0_41 = arith.constant 0 : index
    %c0_42 = arith.constant 0 : index
    %117 = vector.load %arg3[%c6_40, %c0_41, %c0_42] : memref<8x8x288xbf16, #tpu.memory_space<vmem>>, vector<1x8x288xbf16>
    %118 = vector.shape_cast %117 : vector<1x8x288xbf16> to vector<8x288xbf16>
    %119 = vector.shape_cast %116 : vector<8x288xbf16> to vector<1x8x288xbf16>
    tpu.vector_store %arg3[%c6_40, %c0_41, %c0_42], %119 {strides = array<i32>} : memref<8x8x288xbf16, #tpu.memory_space<vmem>>, vector<1x8x288xbf16>,
    %c7 = arith.constant 7 : index
    %c0_43 = arith.constant 0 : index
    %c0_44 = arith.constant 0 : index
    %120 = vector.load %arg2[%c7, %c0_43, %c0_44] : memref<8x4x342xbf16, #tpu.memory_space<vmem>>, vector<1x4x342xbf16>
    %121 = vector.shape_cast %120 : vector<1x4x342xbf16> to vector<4x342xbf16>
    %122 = vector.extract_strided_slice %121 {offsets = [0, 0], sizes = [4, 288], strides = [1, 1]} : vector<4x342xbf16> to vector<4x288xbf16>
    %123 = vector.extract_strided_slice %121 {offsets = [0, 1], sizes = [4, 288], strides = [1, 1]} : vector<4x342xbf16> to vector<4x288xbf16>
    %124 = vector.extract_strided_slice %121 {offsets = [0, 2], sizes = [4, 288], strides = [1, 1]} : vector<4x342xbf16> to vector<4x288xbf16>
    %125 = vector.extract_strided_slice %121 {offsets = [0, 18], sizes = [4, 288], strides = [1, 1]} : vector<4x342xbf16> to vector<4x288xbf16>
    %126 = vector.extract_strided_slice %121 {offsets = [0, 19], sizes = [4, 288], strides = [1, 1]} : vector<4x342xbf16> to vector<4x288xbf16>
    %127 = vector.extract_strided_slice %121 {offsets = [0, 20], sizes = [4, 288], strides = [1, 1]} : vector<4x342xbf16> to vector<4x288xbf16>
    %128 = vector.extract_strided_slice %121 {offsets = [0, 36], sizes = [4, 288], strides = [1, 1]} : vector<4x342xbf16> to vector<4x288xbf16>
    %129 = vector.extract_strided_slice %121 {offsets = [0, 37], sizes = [4, 288], strides = [1, 1]} : vector<4x342xbf16> to vector<4x288xbf16>
    %130 = vector.extract_strided_slice %121 {offsets = [0, 38], sizes = [4, 288], strides = [1, 1]} : vector<4x342xbf16> to vector<4x288xbf16>
    %131 = tpu.concatenate %122, %123, %124, %125, %126, %127, %128, %129, %130 in 0 : vector<4x288xbf16>, vector<4x288xbf16>, vector<4x288xbf16>, vector<4x288xbf16>, vector<4x288xbf16>, vector<4x288xbf16>, vector<4x288xbf16>, vector<4x288xbf16>, vector<4x288xbf16> -> vector<36x288xbf16>
    %cst_45 = arith.constant dense<0.000000e+00> : vector<8x288xf32>
    %132 = tpu.matmul %0, %131, %cst_45 {dimension_numbers = #tpu.dot_dimension_numbers<[1], [0], [0], [1], [0, 0, 1, 1], [], []>} : vector<8x36xbf16>, vector<36x288xbf16>, vector<8x288xf32> -> vector<8x288xf32>
    %133 = arith.truncf %132 : vector<8x288xf32> to vector<8x288xbf16>
    %c7_46 = arith.constant 7 : index
    %c0_47 = arith.constant 0 : index
    %c0_48 = arith.constant 0 : index
    %134 = vector.load %arg3[%c7_46, %c0_47, %c0_48] : memref<8x8x288xbf16, #tpu.memory_space<vmem>>, vector<1x8x288xbf16>
    %135 = vector.shape_cast %134 : vector<1x8x288xbf16> to vector<8x288xbf16>
    %136 = vector.shape_cast %133 : vector<8x288xbf16> to vector<1x8x288xbf16>
    tpu.vector_store %arg3[%c7_46, %c0_47, %c0_48], %136 {strides = array<i32>} : memref<8x8x288xbf16, #tpu.memory_space<vmem>>, vector<1x8x288xbf16>,
    return
  }
  func.func @transform_0(%arg0: i32) -> (i32, i32) {
    %c0_i32 = arith.constant 0 : i32
    %c0_i32_0 = arith.constant 0 : i32
    %c0_i32_1 = arith.constant 0 : i32
    return %c0_i32, %c0_i32_0 : i32, i32
  }
  func.func @transform_1(%arg0: i32) -> (i32, i32, i32) {
    %c0_i32 = arith.constant 0 : i32
    %c0_i32_0 = arith.constant 0 : i32
    %c0_i32_1 = arith.constant 0 : i32
    return %arg0, %c0_i32, %c0_i32_0 : i32, i32, i32
  }
  func.func @transform_2(%arg0: i32) -> (i32, i32, i32) {
    %c0_i32 = arith.constant 0 : i32
    %c0_i32_0 = arith.constant 0 : i32
    %c0_i32_1 = arith.constant 0 : i32
    return %arg0, %c0_i32, %c0_i32_0 : i32, i32, i32
  }
}

</mosaic_0001>

<bundles_post_ra>
// kernel: basic_conv2d_mtsres_forward.1
= control target key start
LH: loop header
LB: loop body
LE: loop exit
PB: predicated region body
PF: predicated region fallthrough
CT: control target
= control target key end

     0   :  { %s2492_s9 = smov 0   ;;  %s3461_s0 = inlined_call_operand.vmem [shape: bf16[8,36], index: 0, kind: input, shape index: {}]   ;;  %s3462_s1 = inlined_call_operand.vmem [shape: bf16[16,4,342], index: 1, kind: input, shape index: {}]   ;;  %s3463_s2 = inlined_call_operand.vmem [shape: bf16[16,8,288], index: 2, kind: output, shape index: {}]  }
   0x1 LB: > { %s2218_s10 = sadd.s32 4294967295, %s2463_s9   ;;  %p2222_p0 = scmp.ge.s32.totalorder %s2463_s9, 1  ;;  %s2463_s9 = sphi %s2492_s9, %s12_s9  }
   0x2   : > { %p114_p1 = scmp.lt.s32.totalorder %s2463_s9, 3 }
   0x4   : > { %p115_p2 = pnand %p2222_p0, %p114_p1 }
   0x5   : > { %s2223_s11 = sshll.u32 (!%p115_p2), %s2218_s10, 3  ;;  %v160_v0 = vlaneseq (!%p115_p2)  ;;  %v2465_v1 = vmov (!%p115_p2), 1983009808   ;;  %s2466_s16 = smov (!%p115_p2), 126   ;;  %v2468_v14 = vmov (!%p115_p2), 0.0   ;;  %vm2475_vm0 = vmmov (!%p115_p2), 0  }
   0x6   : > { %118 = sbr.rel (%p115_p2) target bundleno = 736 (0x2e0), region = 28  ;;  %p139_p3 = scmp.lt.s32.totalorder (!%p115_p2), %s2223_s11, 15  ;;  %v158_v2 = vunpack.c.l.s4 (!%p115_p2), %v2465_v1  ;;  %2338 = vmatprep.subr.bf16.mxu1 (!%p115_p2), %v2468_v14  ;;  %2344 = vmatprep.mubr.msk.bf16.mxu1 (!%p115_p2), %vm2475_vm0, %v2468_v14  ;;  %v2476_v27 = vmov (!%p115_p2), 0   ;;  %vm187_vm1 = vcmask (!%p115_p2), 1039360   ;;  %vm256_vm2 = vcmask (!%p115_p2), 1041408  }
   0x7   : > { %v161_v3 = vshrl.u32 (!%p115_p2), %v160_v0, 7  ;;  %s2467_s17 = smov (!%p115_p2), 127   ;;  %s2469_s18 = smov (!%p115_p2), 110   ;;  %352 = vmatprep.mubr.bf16.mxu0 (!%p115_p2), %v2476_v27  ;;  %vm198_vm3 = vcmask (!%p115_p2), 1031168   ;;  %vm208_vm4 = vcmask (!%p115_p2), 900096   ;;  %vm266_vm5 = vcmask (!%p115_p2), 1043456  }
   0x8   : > { %v159_v4 = vunpack.c.0.s8 (!%p115_p2), %v158_v2  ;;  %s2470_s19 = smov (!%p115_p2), 109   ;;  %s2471_s20 = smov (!%p115_p2), 108   ;;  %vm273_vm6 = vcmask (!%p115_p2), 1045504   ;;  %vm226_vm7 = vcmask (!%p115_p2), 883712   ;;  %vm235_vm8 = vcmask (!%p115_p2), 752640  }
   0x9   : > { %s2472_s21 = smov (!%p115_p2), 92   ;;  %s2473_s22 = smov (!%p115_p2), 91   ;;  %vm217_vm9 = vcmask (!%p115_p2), 891904   ;;  %vm244_vm10 = vcmask (!%p115_p2), 744448   ;;  %vm253_vm11 = vcmask (!%p115_p2), 736256   ;;  %vm307_vm12 = vcmask (!%p115_p2), 293888  }
   0xa   : > { %v2503_v5 = vsub.s32 (!%p115_p2), %v159_v4, %v161_v3  ;;  %s2474_s23 = smov (!%p115_p2), 90   ;;  %vm415_vm13 = vcmask (!%p115_p2), 257024  }
   0xd   : > { %s3465_s11 = smov (!%p139_p3, %s2223_s11), 15 }
   0xe   : > { %s2418_s12 = smul.u32 6, %s3465_s11 }
   0xf   : > { %s2419_s26 = smul.u32 12, %s3465_s11 }
  0x10   : > { %s2508_s15 = scalar_lea.vmem %s3462_s1, %s2418_s12 }
  0x11   : > { %v154_v6 = vld [vmem:[%s2508_s15] sm:$0x3f]  ;;  %v2232_v18 = vld [vmem:[%s2508_s15 + $0x6] sm:$0x3f]  ;;  %v2240_v30 = vld [vmem:[%s2508_s15 + $0xc] sm:$0x3f]  ;;  %s3293_s29 = scalar_lea.vmem %s3463_s2, %s2419_s26 }
  0x12   : > { %v2512_v7 = vrot.slane %v154_v6, %v2503_v5  ;;  %v172_v8 = vcombine.low %v154_v6, %v154_v6  ;;  %v156_v11 = vcombine.high %v154_v6, %v154_v6  ;;  %v436_v19 = vcombine.low %v2232_v18, %v2232_v18  ;;  %v2248_v54 = vld [vmem:[%s2508_s15 + $0x12] sm:$0x3f] }
  0x13   : > { %v2564_v21 = vrot.slane %v2232_v18, %v2503_v5  ;;  %v420_v23 = vcombine.high %v2232_v18, %v2232_v18  ;;  %v685_v31 = vcombine.low %v2240_v30, %v2240_v30  ;;  %v2617_v33 = vrot.slane %v2240_v30, %v2503_v5 }
  0x14   : > { %194 = vrot.lane.b32.xlu0 %v2512_v7, %s2466_s16  ;;  %185 = vrot.lane.b32.xlu1 %v2512_v7, %s2467_s17  ;;  %v179_v9 = vrot.slane %v172_v8, %v2503_v5  ;;  %v190_v10 = vcombine.low %v2512_v7, %v2512_v7  ;;  %v2524_v13 = vrot.slane %v156_v11, %v2503_v5 }
  0x15   : > { %v2535_v17 = vcombine.high %v2512_v7, %v2512_v7  ;;  %v443_v20 = vrot.slane %v436_v19, %v2503_v5  ;;  %v2570_v24 = vrot.slane %v420_v23, %v2503_v5  ;;  %v453_v26 = vcombine.low %v2564_v21, %v2564_v21 }
  0x16   : > { %v180_v12 = vcombine.high %v179_v9, %v179_v9  ;;  %v201_v15 = vcombine.low %v179_v9, %v179_v9  ;;  %v191_v16 = vcombine.low %v2524_v13, %v2524_v13  ;;  %v2588_v29 = vcombine.high %v2564_v21, %v2564_v21 }
  0x17   : > { %v444_v22 = vcombine.high %v443_v20, %v443_v20  ;;  %v454_v25 = vcombine.low %v2570_v24, %v2570_v24  ;;  %v463_v28 = vcombine.low %v443_v20, %v443_v20  ;;  %v692_v32 = vrot.slane %v685_v31, %v2503_v5 }
  0x18   : > { %181 = vrot.lane.b32.xlu0 %v179_v9, %s2467_s17  ;;  %192 = vrot.lane.b32.xlu1 %v190_v10, %s2466_s16  ;;  %v669_v35 = vcombine.high %v2240_v30, %v2240_v30  ;;  %v702_v38 = vcombine.low %v2617_v33, %v2617_v33  ;;  %v2638_v40 = vcombine.high %v2617_v33, %v2617_v33 }
  0x19   : > { %v693_v34 = vcombine.high %v692_v32, %v692_v32  ;;  %v712_v39 = vcombine.low %v692_v32, %v692_v32  ;;  %v934_v2 = vcombine.low %v2248_v54, %v2248_v54 }
  0x1a   : > { %v2623_v36 = vrot.slane %v669_v35, %v2503_v5 }
  0x1c   : > { %183 = vrot.lane.b32.xlu0 %v180_v12, %s2467_s17  ;;  %204 = vrot.lane.b32.xlu1 %v179_v9, %s2469_s18  ;;  %v703_v37 = vcombine.low %v2623_v36, %v2623_v36 }
  0x20   : > { %202 = vrot.lane.b32.xlu0 %v201_v15, %s2469_s18  ;;  %196 = vrot.lane.b32.xlu1 %v191_v16, %s2466_s16 }
  0x24   : > { %206 = vrot.lane.b32.xlu0 %v190_v10, %s2469_s18  ;;  %213 = vrot.lane.b32.xlu1 %v2535_v17, %s2470_s19 }
  0x28   : > { %215 = vrot.lane.b32.xlu0 %v2524_v13, %s2470_s19  ;;  %222 = vrot.lane.b32.xlu1 %v180_v12, %s2471_s20  ;;  %v918_v12 = vcombine.high %v2248_v54, %v2248_v54 }
  0x2c   : > { %224 = vrot.lane.b32.xlu0 %v2512_v7, %s2471_s20  ;;  %211 = vrot.lane.b32.xlu1 %v2512_v7, %s2470_s19 }
  0x30   : > { %220 = vrot.lane.b32.xlu0 %v179_v9, %s2471_s20  ;;  %231 = vrot.lane.b32.xlu1 %v2512_v7, %s2472_s21 }
  0x34   : > { %233 = vrot.lane.b32.xlu0 %v191_v16, %s2472_s21  ;;  %229 = vrot.lane.b32.xlu1 %v190_v10, %s2472_s21  ;;  %v2699_v16 = vrot.slane %v918_v12, %v2503_v5 }
  0x38   : > { %240 = vrot.lane.b32.xlu0 %v179_v9, %s2473_s22  ;;  %242 = vrot.lane.b32.xlu1 %v190_v10, %s2473_s22  ;;  %v2688_v10 = vrot.slane %v2248_v54, %v2503_v5 }
  0x3a   : > { %v2713_v23 = vcombine.low %v2688_v10, %v2688_v10 }
  0x3c   : > { %238 = vrot.lane.b32.xlu0 %v201_v15, %s2473_s22  ;;  %247 = vrot.lane.b32.xlu1 %v2512_v7, %s2474_s23 }
  0x40   : > { %249 = vrot.lane.b32.xlu0 %v2535_v17, %s2474_s23  ;;  %251 = vrot.lane.b32.xlu1 %v2524_v13, %s2474_s23 }
  0x44   : > { %447 = vrot.lane.b32.xlu0 %v444_v22, %s2467_s17  ;;  %449 = vrot.lane.b32.xlu1 %v2564_v21, %s2467_s17 }
  0x48   : > { %445 = vrot.lane.b32.xlu0 %v443_v20, %s2467_s17  ;;  %457 = vrot.lane.b32.xlu1 %v2564_v21, %s2466_s16 }
  0x4c   : > { %459 = vrot.lane.b32.xlu0 %v454_v25, %s2466_s16  ;;  %455 = vrot.lane.b32.xlu1 %v453_v26, %s2466_s16 }
  0x50   : > { %466 = vrot.lane.b32.xlu0 %v443_v20, %s2469_s18  ;;  %468 = vrot.lane.b32.xlu1 %v453_v26, %s2469_s18 }
  0x54   : > { %464 = vrot.lane.b32.xlu0 %v463_v28, %s2469_s18  ;;  %474 = vrot.lane.b32.xlu1 %v2588_v29, %s2470_s19 }
  0x58   : > { %476 = vrot.lane.b32.xlu0 %v2570_v24, %s2470_s19  ;;  %482 = vrot.lane.b32.xlu1 %v444_v22, %s2471_s20  ;;  %v2709_v22 = vcombine.low %v2699_v16, %v2699_v16 }
  0x5c   : > { %484 = vrot.lane.b32.xlu0 %v2564_v21, %s2471_s20  ;;  %472 = vrot.lane.b32.xlu1 %v2564_v21, %s2470_s19 }
  0x60   : > { %480 = vrot.lane.b32.xlu0 %v443_v20, %s2471_s20  ;;  %490 = vrot.lane.b32.xlu1 %v2564_v21, %s2472_s21 }
  0x64   : > { %492 = vrot.lane.b32.xlu0 %v454_v25, %s2472_s21  ;;  %488 = vrot.lane.b32.xlu1 %v453_v26, %s2472_s21 }
  0x68   : > { %498 = vrot.lane.b32.xlu0 %v443_v20, %s2473_s22  ;;  %500 = vrot.lane.b32.xlu1 %v453_v26, %s2473_s22 }
  0x6c   : > { %496 = vrot.lane.b32.xlu0 %v463_v28, %s2473_s22  ;;  %504 = vrot.lane.b32.xlu1 %v2564_v21, %s2474_s23 }
  0x70   : > { %506 = vrot.lane.b32.xlu0 %v2588_v29, %s2474_s23  ;;  %508 = vrot.lane.b32.xlu1 %v2570_v24, %s2474_s23 }
  0x74   : > { %696 = vrot.lane.b32.xlu0 %v693_v34, %s2467_s17  ;;  %698 = vrot.lane.b32.xlu1 %v2617_v33, %s2467_s17 }
  0x78   : > { %694 = vrot.lane.b32.xlu0 %v692_v32, %s2467_s17  ;;  %706 = vrot.lane.b32.xlu1 %v2617_v33, %s2466_s16 }
  0x7c   : > { %708 = vrot.lane.b32.xlu0 %v703_v37, %s2466_s16  ;;  %704 = vrot.lane.b32.xlu1 %v702_v38, %s2466_s16 }
  0x80   : > { %715 = vrot.lane.b32.xlu0 %v692_v32, %s2469_s18  ;;  %717 = vrot.lane.b32.xlu1 %v702_v38, %s2469_s18 }
  0x84   : > { %713 = vrot.lane.b32.xlu0 %v712_v39, %s2469_s18  ;;  %723 = vrot.lane.b32.xlu1 %v2638_v40, %s2470_s19 }
  0x86   : > { %v195_v41 = vpop.permute.xlu0 %194  ;;  %v186_v42 = vpop.permute.xlu1 %185 }
  0x87   : > { %v265_v52 = vsel %vm256_vm2, %v2524_v13, %v186_v42 }
  0x88   : > { %725 = vrot.lane.b32.xlu0 %v2623_v36, %s2470_s19  ;;  %731 = vrot.lane.b32.xlu1 %v693_v34, %s2471_s20 }
  0x8a   : > { %v182_v43 = vpop.permute.xlu0 %181  ;;  %v193_v44 = vpop.permute.xlu1 %192 }
  0x8b   : > { %v199_v60 = vsel %vm198_vm3, %v193_v44, %v195_v41 }
  0x8c   : > { %733 = vrot.lane.b32.xlu0 %v2617_v33, %s2471_s20  ;;  %721 = vrot.lane.b32.xlu1 %v2617_v33, %s2470_s19 }
  0x8e   : > { %v184_v45 = vpop.permute.xlu0 %183  ;;  %v205_v46 = vpop.permute.xlu1 %204 }
  0x8f   : > { %v188_v47 = vsel %vm187_vm1, %v182_v43, %v184_v45  ;;  %v189_v50 = vsel %vm187_vm1, %v184_v45, %v186_v42 }
  0x90   : > { %729 = vrot.lane.b32.xlu0 %v692_v32, %s2471_s20  ;;  %739 = vrot.lane.b32.xlu1 %v2617_v33, %s2472_s21  ;;  %v259_v53 = vsel %vm256_vm2, %v2512_v7, %v188_v47  ;;  %v262_v59 = vsel %vm256_vm2, %v2535_v17, %v189_v50  ;;  %v2681_v7 = vrot.slane %v934_v2, %v2503_v5 }
  0x91   : > { %v268_v1 = vsel %vm266_vm5, %v259_v53, %v199_v60  ;;  %v2745_v50 = vcombine.high %v2688_v10, %v2688_v10 }
  0x92   : > { %v203_v48 = vpop.permute.xlu0 %202  ;;  %v197_v49 = vpop.permute.xlu1 %196  ;;  %v2692_v11 = vcombine.high %v2681_v7, %v2681_v7 }
  0x93   : > { %v200_v51 = vsel %vm198_vm3, %v195_v41, %v197_v49  ;;  %v209_v55 = vsel %vm208_vm4, %v203_v48, %v205_v46  ;;  %v272_v58 = vsel %vm266_vm5, %v265_v52, %v197_v49  ;;  %v2741_v49 = vcombine.low %v2681_v7, %v2681_v7 }
  0x94   : > { %741 = vrot.lane.b32.xlu0 %v703_v37, %s2472_s21  ;;  %737 = vrot.lane.b32.xlu1 %v702_v38, %s2472_s21  ;;  %v270_v63 = vsel %vm266_vm5, %v262_v59, %v200_v51  ;;  %v275_v3 = vsel %vm273_vm6, %v268_v1, %v209_v55  ;;  %v2760_v59 = vld [vmem:[%s3461_s0] sm:$0xf] }
  0x96   : > { %v207_v56 = vpop.permute.xlu0 %206  ;;  %v214_v57 = vpop.permute.xlu1 %213 }
  0x97   : > { %v281_v61 = vsel %vm273_vm6, %v272_v58, %v207_v56  ;;  %v210_v62 = vsel %vm208_vm4, %v205_v46, %v207_v56 }
  0x98   : > { %747 = vrot.lane.b32.xlu0 %v692_v32, %s2473_s22  ;;  %749 = vrot.lane.b32.xlu1 %v702_v38, %s2473_s22  ;;  %v278_v0 = vsel %vm273_vm6, %v270_v63, %v210_v62 }
  0x99   : > { %2339 = vmatpush3.bf16.msra.mxu1 %v281_v61  ;;  %320 = vmatprep.subr.bf16.mxu0 %v278_v0 }
  0x9a   : > { %v216_v4 = vpop.permute.xlu0 %215  ;;  %321 = vmatpush1.bf16.msra.mxu0 %v275_v3  ;;  %v223_v6 = vpop.permute.xlu1 %222  ;;  %2340 = vmatprep.subr.bf16.mxu1 %v2468_v14 }
  0x9b   : > { %v219_v25 = vsel %vm217_vm9, %v214_v57, %v216_v4 }
  0x9c   : > { %745 = vrot.lane.b32.xlu0 %v712_v39, %s2473_s22  ;;  %753 = vrot.lane.b32.xlu1 %v2617_v33, %s2474_s23 }
  0x9e   : > { %v225_v8 = vpop.permute.xlu0 %224  ;;  %v212_v9 = vpop.permute.xlu1 %211 }
  0x9f   : > { %v228_v19 = vsel %vm226_vm7, %v223_v6, %v225_v8  ;;  %v291_v26 = vsel %vm256_vm2, %v216_v4, %v225_v8  ;;  %v218_v42 = vsel %vm217_vm9, %v212_v9, %v214_v57 }
  0xa0   : > { %755 = vrot.lane.b32.xlu0 %v2638_v40, %s2474_s23  ;;  %757 = vrot.lane.b32.xlu1 %v2623_v36, %s2474_s23  ;;  %v288_v28 = vsel %vm256_vm2, %v219_v25, %v228_v19 }
  0xa2   : > { %v221_v13 = vpop.permute.xlu0 %220  ;;  %v232_v15 = vpop.permute.xlu1 %231 }
  0xa3   : > { %v227_v34 = vsel %vm226_vm7, %v221_v13, %v223_v6 }
  0xa4   : > { %945 = vrot.lane.b32.xlu0 %v2692_v11, %s2467_s17  ;;  %947 = vrot.lane.b32.xlu1 %v2688_v10, %s2467_s17  ;;  %v285_v43 = vsel %vm256_vm2, %v218_v42, %v227_v34 }
  0xa6   : > { %v234_v17 = vpop.permute.xlu0 %233  ;;  %v230_v18 = vpop.permute.xlu1 %229 }
  0xa7   : > { %v237_v20 = vsel %vm235_vm8, %v232_v15, %v234_v17  ;;  %v297_v30 = vsel %vm266_vm5, %v291_v26, %v234_v17  ;;  %v236_v39 = vsel %vm235_vm8, %v230_v18, %v232_v15 }
  0xa8   : > { %943 = vrot.lane.b32.xlu0 %v2681_v7, %s2467_s17  ;;  %955 = vrot.lane.b32.xlu1 %v2688_v10, %s2466_s16  ;;  %v295_v38 = vsel %vm266_vm5, %v288_v28, %v237_v20  ;;  %v293_v47 = vsel %vm266_vm5, %v285_v43, %v236_v39 }
  0xaa   : > { %v241_v31 = vpop.permute.xlu0 %240  ;;  %v243_v32 = vpop.permute.xlu1 %242 }
  0xab   : > { %v246_v35 = vsel %vm244_vm10, %v241_v31, %v243_v32  ;;  %v305_v37 = vsel %vm273_vm6, %v297_v30, %v243_v32 }
  0xac   : > { %957 = vrot.lane.b32.xlu0 %v2709_v22, %s2466_s16  ;;  %953 = vrot.lane.b32.xlu1 %v2713_v23, %s2466_s16  ;;  %v302_v41 = vsel %vm273_vm6, %v295_v38, %v246_v35 }
  0xad   : > { %2341 = vmatpush3.bf16.msra.mxu1 %v305_v37  ;;  %322 = vmatprep.subr.bf16.mxu0 %v302_v41 }
  0xae   : > { %v239_v44 = vpop.permute.xlu0 %238  ;;  %v248_v45 = vpop.permute.xlu1 %247  ;;  %2342 = vmatprep.subr.bf16.mxu1 %v2468_v14 }
  0xaf   : > { %v245_v46 = vsel %vm244_vm10, %v239_v44, %v241_v31 }
  0xb0   : > { %964 = vrot.lane.b32.xlu0 %v2681_v7, %s2469_s18  ;;  %966 = vrot.lane.b32.xlu1 %v2713_v23, %s2469_s18  ;;  %v299_v48 = vsel %vm273_vm6, %v293_v47, %v245_v46 }
  0xb1   : > { %323 = vmatpush1.bf16.msra.mxu0 %v299_v48 }
  0xb2   : > { %v250_v51 = vpop.permute.xlu0 %249  ;;  %v252_v52 = vpop.permute.xlu1 %251 }
  0xb3   : > { %v255_v53 = vsel %vm253_vm11, %v250_v51, %v252_v52  ;;  %v318_v54 = vsel %vm256_vm2, %v252_v52, 0  ;;  %v254_v55 = vsel %vm253_vm11, %v248_v45, %v250_v51 }
  0xb4   : > { %962 = vrot.lane.b32.xlu0 %v2741_v49, %s2469_s18  ;;  %972 = vrot.lane.b32.xlu1 %v2745_v50, %s2470_s19  ;;  %v312_v56 = vsel %vm256_vm2, %v254_v55, 0 }
  0xb5   : > { %2227 = vmatprep.subr.msk.bf16.mxu0 %vm256_vm2, %v255_v53  ;;  %2343 = vmatpush3.bf16.msra.mxu1 %v318_v54 }
  0xb6   : > { %325 = vmatpush1.bf16.msra.mxu0 %v312_v56  ;;  %v448_v57 = vpop.permute.xlu0 %447  ;;  %v450_v58 = vpop.permute.xlu1 %449  ;;  %2348 = vmatprep.subr.bf16.mxu1 %v2468_v14 }
  0xb7   : > { %v452_v0 = vsel %vm187_vm1, %v448_v57, %v450_v58  ;;  %v520_v2 = vsel %vm256_vm2, %v2570_v24, %v450_v58 }
  0xb8   : > { %974 = vrot.lane.b32.xlu0 %v2699_v16, %s2470_s19  ;;  %980 = vrot.lane.b32.xlu1 %v2692_v11, %s2471_s20  ;;  %v517_v3 = vsel %vm256_vm2, %v2588_v29, %v452_v0  ;;  %v2256_v29 = vld [vmem:[%s2508_s15 + $0x18] sm:$0x3f] }
  0xb9   : > { %2345 = vmatmul.mubr.msk.bf16.vlgmr.msra.gmra.mrb[0].mxu1 %vm307_vm12, %v2760_v59  ;;  %2228 = vmatmul.mubr.msk.bf16.vlgmr.msra.gmra.mrb[0].mxu0 %vm307_vm12, %v2760_v59  ;;  %v1183_v26 = vcombine.low %v2256_v29, %v2256_v29  ;;  %v1167_v34 = vcombine.high %v2256_v29, %v2256_v29 }
  0xba   : > { %v446_v60 = vpop.permute.xlu0 %445  ;;  %v458_v61 = vpop.permute.xlu1 %457  ;;  %2354 = vmatprep.mubr.msk.bf16.mxu1 %vm2475_vm0, %v2468_v14  ;;  %601 = vmatprep.mubr.bf16.mxu0 %v2476_v27 }
  0xbb   : > { %v451_v9 = vsel %vm187_vm1, %v446_v60, %v448_v57  ;;  %v2814_v30 = vrot.slane %v1183_v26, %v2503_v5  ;;  %v2829_v38 = vrot.slane %v1167_v34, %v2503_v5 }
  0xbc   : > { %982 = vrot.lane.b32.xlu0 %v2688_v10, %s2471_s20  ;;  %970 = vrot.lane.b32.xlu1 %v2688_v10, %s2470_s19  ;;  %v514_v17 = vsel %vm256_vm2, %v2564_v21, %v451_v9 }
  0xbd   : > { %v1191_v32 = vcombine.high %v2814_v30, %v2814_v30  ;;  %v2839_v44 = vcombine.low %v2829_v38, %v2829_v38 }
  0xbe   : > { %v460_v62 = vpop.permute.xlu0 %459  ;;  %v456_v63 = vpop.permute.xlu1 %455 }
  0xbf   : > { %v462_v1 = vsel %vm198_vm3, %v458_v61, %v460_v62  ;;  %v526_v4 = vsel %vm266_vm5, %v520_v2, %v460_v62  ;;  %v461_v15 = vsel %vm198_vm3, %v456_v63, %v458_v61 }
  0xc0   : > { %978 = vrot.lane.b32.xlu0 %v2681_v7, %s2471_s20  ;;  %988 = vrot.lane.b32.xlu1 %v2688_v10, %s2472_s21  ;;  %v524_v13 = vsel %vm266_vm5, %v517_v3, %v462_v1  ;;  %v522_v20 = vsel %vm266_vm5, %v514_v17, %v461_v15  ;;  %v1210_v3 = vcombine.low %v2814_v30, %v2814_v30 }
  0xc2   : > { %v467_v6 = vpop.permute.xlu0 %466  ;;  %v469_v8 = vpop.permute.xlu1 %468 }
  0xc3   : > { %v471_v11 = vsel %vm208_vm4, %v467_v6, %v469_v8  ;;  %v534_v12 = vsel %vm273_vm6, %v526_v4, %v469_v8 }
  0xc4   : > { %990 = vrot.lane.b32.xlu0 %v2709_v22, %s2472_s21  ;;  %986 = vrot.lane.b32.xlu1 %v2713_v23, %s2472_s21  ;;  %v531_v24 = vsel %vm273_vm6, %v524_v13, %v471_v11 }
  0xc5   : > { %2349 = vmatpush3.bf16.msra.mxu1 %v534_v12  ;;  %569 = vmatprep.subr.bf16.mxu0 %v531_v24 }
  0xc6   : > { %v465_v18 = vpop.permute.xlu0 %464  ;;  %v475_v19 = vpop.permute.xlu1 %474  ;;  %2350 = vmatprep.subr.bf16.mxu1 %v2468_v14 }
  0xc7   : > { %v470_v25 = vsel %vm208_vm4, %v465_v18, %v467_v6 }
  0xc8   : > { %996 = vrot.lane.b32.xlu0 %v2681_v7, %s2473_s22  ;;  %998 = vrot.lane.b32.xlu1 %v2713_v23, %s2473_s22  ;;  %v528_v22 = vsel %vm273_vm6, %v522_v20, %v470_v25  ;;  %v2821_v23 = vrot.slane %v2256_v29, %v2503_v5 }
  0xc9   : > { %570 = vmatpush1.bf16.msra.mxu0 %v528_v22 }
  0xca   : > { %v477_v28 = vpop.permute.xlu0 %476  ;;  %v483_v21 = vpop.permute.xlu1 %482  ;;  %v2843_v45 = vcombine.low %v2821_v23, %v2821_v23  ;;  %v2873_v4 = vcombine.high %v2821_v23, %v2821_v23 }
  0xcb   : > { %v479_v46 = vsel %vm217_vm9, %v475_v19, %v477_v28 }
  0xcc   : > { %994 = vrot.lane.b32.xlu0 %v2741_v49, %s2473_s22  ;;  %1002 = vrot.lane.b32.xlu1 %v2688_v10, %s2474_s23 }
  0xce   : > { %v485_v31 = vpop.permute.xlu0 %484  ;;  %v473_v7 = vpop.permute.xlu1 %472 }
  0xcf   : > { %v487_v42 = vsel %vm226_vm7, %v483_v21, %v485_v31  ;;  %v544_v47 = vsel %vm256_vm2, %v477_v28, %v485_v31  ;;  %v478_v60 = vsel %vm217_vm9, %v473_v7, %v475_v19 }
  0xd0   : > { %1004 = vrot.lane.b32.xlu0 %v2745_v50, %s2474_s23  ;;  %1006 = vrot.lane.b32.xlu1 %v2699_v16, %s2474_s23  ;;  %v541_v48 = vsel %vm256_vm2, %v479_v46, %v487_v42 }
  0xd2   : > { %v481_v35 = vpop.permute.xlu0 %480  ;;  %v491_v37 = vpop.permute.xlu1 %490 }
  0xd3   : > { %v486_v53 = vsel %vm226_vm7, %v481_v35, %v483_v21 }
  0xd4   : > { %1194 = vrot.lane.b32.xlu0 %v1191_v32, %s2467_s17  ;;  %1196 = vrot.lane.b32.xlu1 %v2821_v23, %s2467_s17  ;;  %v538_v61 = vsel %vm256_vm2, %v478_v60, %v486_v53 }
  0xd6   : > { %v493_v39 = vpop.permute.xlu0 %492  ;;  %v489_v41 = vpop.permute.xlu1 %488 }
  0xd7   : > { %v495_v43 = vsel %vm235_vm8, %v491_v37, %v493_v39  ;;  %v550_v49 = vsel %vm266_vm5, %v544_v47, %v493_v39  ;;  %v494_v57 = vsel %vm235_vm8, %v489_v41, %v491_v37 }
  0xd8   : > { %1192 = vrot.lane.b32.xlu0 %v2814_v30, %s2467_s17  ;;  %1204 = vrot.lane.b32.xlu1 %v2821_v23, %s2466_s16  ;;  %v548_v56 = vsel %vm266_vm5, %v541_v48, %v495_v43  ;;  %v546_v0 = vsel %vm266_vm5, %v538_v61, %v494_v57 }
  0xda   : > { %v499_v51 = vpop.permute.xlu0 %498  ;;  %v501_v52 = vpop.permute.xlu1 %500 }
  0xdb   : > { %v503_v54 = vsel %vm244_vm10, %v499_v51, %v501_v52  ;;  %v558_v55 = vsel %vm273_vm6, %v550_v49, %v501_v52 }
  0xdc   : > { %1206 = vrot.lane.b32.xlu0 %v2839_v44, %s2466_s16  ;;  %1202 = vrot.lane.b32.xlu1 %v2843_v45, %s2466_s16  ;;  %v555_v58 = vsel %vm273_vm6, %v548_v56, %v503_v54 }
  0xdd   : > { %2351 = vmatpush3.bf16.msra.mxu1 %v558_v55  ;;  %571 = vmatprep.subr.bf16.mxu0 %v555_v58 }
  0xde   : > { %v497_v62 = vpop.permute.xlu0 %496  ;;  %v505_v63 = vpop.permute.xlu1 %504  ;;  %2352 = vmatprep.subr.bf16.mxu1 %v2468_v14 }
  0xdf   : > { %v502_v1 = vsel %vm244_vm10, %v497_v62, %v499_v51 }
  0xe0   : > { %1213 = vrot.lane.b32.xlu0 %v2814_v30, %s2469_s18  ;;  %1215 = vrot.lane.b32.xlu1 %v2843_v45, %s2469_s18  ;;  %v552_v2 = vsel %vm273_vm6, %v546_v0, %v502_v1 }
  0xe1   : > { %572 = vmatpush1.bf16.msra.mxu0 %v552_v2 }
  0xe2   : > { %v507_v6 = vpop.permute.xlu0 %506  ;;  %v509_v8 = vpop.permute.xlu1 %508 }
  0xe3   : > { %v510_v9 = vsel %vm253_vm11, %v505_v63, %v507_v6  ;;  %v511_v11 = vsel %vm253_vm11, %v507_v6, %v509_v8  ;;  %v567_v12 = vsel %vm256_vm2, %v509_v8, 0 }
  0xe4   : > { %1211 = vrot.lane.b32.xlu0 %v1210_v3, %s2469_s18  ;;  %1221 = vrot.lane.b32.xlu1 %v2873_v4, %s2470_s19  ;;  %v561_v13 = vsel %vm256_vm2, %v510_v9, 0 }
  0xe5   : > { %2233 = vmatprep.subr.msk.bf16.mxu0 %vm256_vm2, %v511_v11  ;;  %2353 = vmatpush3.bf16.msra.mxu1 %v567_v12 }
  0xe6   : > { %574 = vmatpush1.bf16.msra.mxu0 %v561_v13  ;;  %v697_v15 = vpop.permute.xlu0 %696  ;;  %v699_v24 = vpop.permute.xlu1 %698  ;;  %2358 = vmatprep.subr.bf16.mxu1 %v2468_v14 }
  0xe7   : > { %v701_v20 = vsel %vm187_vm1, %v697_v15, %v699_v24  ;;  %v769_v22 = vsel %vm256_vm2, %v2623_v36, %v699_v24 }
  0xe8   : > { %1223 = vrot.lane.b32.xlu0 %v2829_v38, %s2470_s19  ;;  %1229 = vrot.lane.b32.xlu1 %v1191_v32, %s2471_s20  ;;  %v766_v26 = vsel %vm256_vm2, %v2638_v40, %v701_v20  ;;  %v2264_v40 = vld [vmem:[%s2508_s15 + $0x1e] sm:$0x3f] }
  0xe9   : > { %2355 = vmatmul.mubr.msk.bf16.vlgmr.msra.gmra.mrb[4].mxu1 %vm307_vm12, %v2760_v59  ;;  %2234 = vmatmul.mubr.msk.bf16.vlgmr.msra.gmra.mrb[4].mxu0 %vm307_vm12, %v2760_v59  ;;  %v1432_v47 = vcombine.low %v2264_v40, %v2264_v40  ;;  %v1416_v53 = vcombine.high %v2264_v40, %v2264_v40 }
  0xea   : > { %v695_v29 = vpop.permute.xlu0 %694  ;;  %v707_v17 = vpop.permute.xlu1 %706  ;;  %2364 = vmatprep.mubr.msk.bf16.mxu1 %vm2475_vm0, %v2468_v14  ;;  %850 = vmatprep.mubr.bf16.mxu0 %v2476_v27 }
  0xeb   : > { %v700_v7 = vsel %vm187_vm1, %v695_v29, %v697_v15  ;;  %v2934_v49 = vrot.slane %v1432_v47, %v2503_v5  ;;  %v2949_v56 = vrot.slane %v1416_v53, %v2503_v5 }
  0xec   : > { %1231 = vrot.lane.b32.xlu0 %v2821_v23, %s2471_s20  ;;  %1219 = vrot.lane.b32.xlu1 %v2821_v23, %s2470_s19  ;;  %v763_v39 = vsel %vm256_vm2, %v2617_v33, %v700_v7 }
  0xed   : > { %v2959_v62 = vcombine.low %v2949_v56, %v2949_v56 }
  0xee   : > { %v709_v18 = vpop.permute.xlu0 %708  ;;  %v705_v19 = vpop.permute.xlu1 %704 }
  0xef   : > { %v711_v25 = vsel %vm198_vm3, %v707_v17, %v709_v18  ;;  %v775_v28 = vsel %vm266_vm5, %v769_v22, %v709_v18  ;;  %v710_v37 = vsel %vm198_vm3, %v705_v19, %v707_v17 }
  0xf0   : > { %1227 = vrot.lane.b32.xlu0 %v2814_v30, %s2471_s20  ;;  %1237 = vrot.lane.b32.xlu1 %v2821_v23, %s2472_s21  ;;  %v773_v35 = vsel %vm266_vm5, %v766_v26, %v711_v25  ;;  %v771_v43 = vsel %vm266_vm5, %v763_v39, %v710_v37  ;;  %v1459_v26 = vcombine.low %v2934_v49, %v2934_v49 }
  0xf2   : > { %v716_v21 = vpop.permute.xlu0 %715  ;;  %v718_v31 = vpop.permute.xlu1 %717 }
  0xf3   : > { %v720_v32 = vsel %vm208_vm4, %v716_v21, %v718_v31  ;;  %v783_v34 = vsel %vm273_vm6, %v775_v28, %v718_v31 }
  0xf4   : > { %1239 = vrot.lane.b32.xlu0 %v2839_v44, %s2472_s21  ;;  %1235 = vrot.lane.b32.xlu1 %v2843_v45, %s2472_s21  ;;  %v780_v36 = vsel %vm273_vm6, %v773_v35, %v720_v32 }
  0xf5   : > { %2359 = vmatpush3.bf16.msra.mxu1 %v783_v34  ;;  %818 = vmatprep.subr.bf16.mxu0 %v780_v36 }
  0xf6   : > { %v714_v41 = vpop.permute.xlu0 %713  ;;  %v724_v42 = vpop.permute.xlu1 %723  ;;  %2360 = vmatprep.subr.bf16.mxu1 %v2468_v14 }
  0xf7   : > { %v719_v46 = vsel %vm208_vm4, %v714_v41, %v716_v21 }
  0xf8   : > { %1245 = vrot.lane.b32.xlu0 %v2814_v30, %s2473_s22  ;;  %1247 = vrot.lane.b32.xlu1 %v2843_v45, %s2473_s22  ;;  %v777_v44 = vsel %vm273_vm6, %v771_v43, %v719_v46  ;;  %v2941_v30 = vrot.slane %v2264_v40, %v2503_v5  ;;  %v1440_v45 = vcombine.high %v2934_v49, %v2934_v49 }
  0xf9   : > { %819 = vmatpush1.bf16.msra.mxu0 %v777_v44 }
  0xfa   : > { %v726_v48 = vpop.permute.xlu0 %725  ;;  %v732_v33 = vpop.permute.xlu1 %731  ;;  %v2963_v63 = vcombine.low %v2941_v30, %v2941_v30  ;;  %v2993_v28 = vcombine.high %v2941_v30, %v2941_v30 }
  0xfb   : > { %v728_v0 = vsel %vm217_vm9, %v724_v42, %v726_v48 }
  0xfc   : > { %1243 = vrot.lane.b32.xlu0 %v1210_v3, %s2473_s22  ;;  %1251 = vrot.lane.b32.xlu1 %v2821_v23, %s2474_s23 }
  0xfe   : > { %v734_v51 = vpop.permute.xlu0 %733  ;;  %v722_v52 = vpop.permute.xlu1 %721 }
  0xff   : > { %v736_v60 = vsel %vm226_vm7, %v732_v33, %v734_v51  ;;  %v793_v1 = vsel %vm256_vm2, %v726_v48, %v734_v51  ;;  %v727_v29 = vsel %vm217_vm9, %v722_v52, %v724_v42 }
 0x100   : > { %1253 = vrot.lane.b32.xlu0 %v2873_v4, %s2474_s23  ;;  %1255 = vrot.lane.b32.xlu1 %v2829_v38, %s2474_s23  ;;  %v790_v2 = vsel %vm256_vm2, %v728_v0, %v736_v60 }
 0x102   : > { %v730_v54 = vpop.permute.xlu0 %729  ;;  %v740_v55 = vpop.permute.xlu1 %739 }
 0x103   : > { %v735_v9 = vsel %vm226_vm7, %v730_v54, %v732_v33 }
 0x104   : > { %1443 = vrot.lane.b32.xlu0 %v1440_v45, %s2467_s17  ;;  %1445 = vrot.lane.b32.xlu1 %v2941_v30, %s2467_s17  ;;  %v787_v17 = vsel %vm256_vm2, %v727_v29, %v735_v9 }
 0x106   : > { %v742_v57 = vpop.permute.xlu0 %741  ;;  %v738_v58 = vpop.permute.xlu1 %737 }
 0x107   : > { %v744_v61 = vsel %vm235_vm8, %v740_v55, %v742_v57  ;;  %v799_v3 = vsel %vm266_vm5, %v793_v1, %v742_v57  ;;  %v743_v15 = vsel %vm235_vm8, %v738_v58, %v740_v55 }
 0x108   : > { %1441 = vrot.lane.b32.xlu0 %v2934_v49, %s2467_s17  ;;  %1453 = vrot.lane.b32.xlu1 %v2941_v30, %s2466_s16  ;;  %v797_v13 = vsel %vm266_vm5, %v790_v2, %v744_v61  ;;  %v795_v20 = vsel %vm266_vm5, %v787_v17, %v743_v15 }
 0x10a   : > { %v748_v6 = vpop.permute.xlu0 %747  ;;  %v750_v8 = vpop.permute.xlu1 %749 }
 0x10b   : > { %v752_v11 = vsel %vm244_vm10, %v748_v6, %v750_v8  ;;  %v807_v12 = vsel %vm273_vm6, %v799_v3, %v750_v8 }
 0x10c   : > { %1455 = vrot.lane.b32.xlu0 %v2959_v62, %s2466_s16  ;;  %1451 = vrot.lane.b32.xlu1 %v2963_v63, %s2466_s16  ;;  %v804_v24 = vsel %vm273_vm6, %v797_v13, %v752_v11 }
 0x10d   : > { %2361 = vmatpush3.bf16.msra.mxu1 %v807_v12  ;;  %820 = vmatprep.subr.bf16.mxu0 %v804_v24 }
 0x10e   : > { %v746_v18 = vpop.permute.xlu0 %745  ;;  %v754_v19 = vpop.permute.xlu1 %753  ;;  %2362 = vmatprep.subr.bf16.mxu1 %v2468_v14 }
 0x10f   : > { %v751_v25 = vsel %vm244_vm10, %v746_v18, %v748_v6 }
 0x110   : > { %1462 = vrot.lane.b32.xlu0 %v2934_v49, %s2469_s18  ;;  %1464 = vrot.lane.b32.xlu1 %v2963_v63, %s2469_s18  ;;  %v801_v22 = vsel %vm273_vm6, %v795_v20, %v751_v25 }
 0x111   : > { %821 = vmatpush1.bf16.msra.mxu0 %v801_v22 }
 0x112   : > { %v756_v21 = vpop.permute.xlu0 %755  ;;  %v758_v31 = vpop.permute.xlu1 %757 }
 0x113   : > { %v759_v7 = vsel %vm253_vm11, %v754_v19, %v756_v21  ;;  %v760_v32 = vsel %vm253_vm11, %v756_v21, %v758_v31  ;;  %v816_v34 = vsel %vm256_vm2, %v758_v31, 0 }
 0x114   : > { %1460 = vrot.lane.b32.xlu0 %v1459_v26, %s2469_s18  ;;  %1470 = vrot.lane.b32.xlu1 %v2993_v28, %s2470_s19  ;;  %v810_v35 = vsel %vm256_vm2, %v759_v7, 0 }
 0x115   : > { %2241 = vmatprep.subr.msk.bf16.mxu0 %vm256_vm2, %v760_v32  ;;  %2363 = vmatpush3.bf16.msra.mxu1 %v816_v34 }
 0x116   : > { %823 = vmatpush1.bf16.msra.mxu0 %v810_v35  ;;  %v946_v37 = vpop.permute.xlu0 %945  ;;  %v948_v36 = vpop.permute.xlu1 %947  ;;  %2368 = vmatprep.subr.bf16.mxu1 %v2468_v14 }
 0x117   : > { %v950_v43 = vsel %vm187_vm1, %v946_v37, %v948_v36  ;;  %v1018_v44 = vsel %vm256_vm2, %v2699_v16, %v948_v36 }
 0x118   : > { %1472 = vrot.lane.b32.xlu0 %v2949_v56, %s2470_s19  ;;  %1478 = vrot.lane.b32.xlu1 %v1440_v45, %s2471_s20  ;;  %v1015_v47 = vsel %vm256_vm2, %v2745_v50, %v950_v43  ;;  %v2272_v50 = vld [vmem:[%s2508_s15 + $0x24] sm:$0x3f] }
 0x119   : > { %2365 = vmatmul.mubr.msk.bf16.vlgmr.msra.gmra.mrb[8].mxu1 %vm307_vm12, %v2760_v59  ;;  %2242 = vmatmul.mubr.msk.bf16.vlgmr.msra.gmra.mrb[8].mxu0 %vm307_vm12, %v2760_v59  ;;  %v1681_v1 = vcombine.low %v2272_v50, %v2272_v50  ;;  %v1665_v9 = vcombine.high %v2272_v50, %v2272_v50 }
 0x11a   : > { %v944_v40 = vpop.permute.xlu0 %943  ;;  %v956_v39 = vpop.permute.xlu1 %955  ;;  %2374 = vmatprep.mubr.msk.bf16.mxu1 %vm2475_vm0, %v2468_v14  ;;  %1099 = vmatprep.mubr.bf16.mxu0 %v2476_v27 }
 0x11b   : > { %v949_v52 = vsel %vm187_vm1, %v944_v40, %v946_v37  ;;  %v3054_v3 = vrot.slane %v1681_v1, %v2503_v5  ;;  %v3069_v13 = vrot.slane %v1665_v9, %v2503_v5 }
 0x11c   : > { %1480 = vrot.lane.b32.xlu0 %v2941_v30, %s2471_s20  ;;  %1468 = vrot.lane.b32.xlu1 %v2941_v30, %s2470_s19  ;;  %v1012_v57 = vsel %vm256_vm2, %v2688_v10, %v949_v52 }
 0x11d   : > { %v3079_v18 = vcombine.low %v3069_v13, %v3069_v13 }
 0x11e   : > { %v958_v41 = vpop.permute.xlu0 %957  ;;  %v954_v42 = vpop.permute.xlu1 %953 }
 0x11f   : > { %v960_v46 = vsel %vm198_vm3, %v956_v39, %v958_v41  ;;  %v1024_v48 = vsel %vm266_vm5, %v1018_v44, %v958_v41  ;;  %v959_v55 = vsel %vm198_vm3, %v954_v42, %v956_v39 }
 0x120   : > { %1476 = vrot.lane.b32.xlu0 %v2934_v49, %s2471_s20  ;;  %1486 = vrot.lane.b32.xlu1 %v2941_v30, %s2472_s21  ;;  %v1022_v54 = vsel %vm266_vm5, %v1015_v47, %v960_v46  ;;  %v1020_v61 = vsel %vm266_vm5, %v1012_v57, %v959_v55  ;;  %v1708_v47 = vcombine.low %v3054_v3, %v3054_v3 }
 0x122   : > { %v965_v33 = vpop.permute.xlu0 %964  ;;  %v967_v51 = vpop.permute.xlu1 %966 }
 0x123   : > { %v969_v45 = vsel %vm208_vm4, %v965_v33, %v967_v51  ;;  %v1032_v53 = vsel %vm273_vm6, %v1024_v48, %v967_v51 }
 0x124   : > { %1488 = vrot.lane.b32.xlu0 %v2959_v62, %s2472_s21  ;;  %1484 = vrot.lane.b32.xlu1 %v2963_v63, %s2472_s21  ;;  %v1029_v16 = vsel %vm273_vm6, %v1022_v54, %v969_v45 }
 0x125   : > { %2369 = vmatpush3.bf16.msra.mxu1 %v1032_v53  ;;  %1067 = vmatprep.subr.bf16.mxu0 %v1029_v16 }
 0x126   : > { %v963_v58 = vpop.permute.xlu0 %962  ;;  %v973_v60 = vpop.permute.xlu1 %972  ;;  %2370 = vmatprep.subr.bf16.mxu1 %v2468_v14 }
 0x127   : > { %v968_v0 = vsel %vm208_vm4, %v963_v58, %v965_v33 }
 0x128   : > { %1494 = vrot.lane.b32.xlu0 %v2934_v49, %s2473_s22  ;;  %1496 = vrot.lane.b32.xlu1 %v2963_v63, %s2473_s22  ;;  %v1026_v62 = vsel %vm273_vm6, %v1020_v61, %v968_v0  ;;  %v3061_v49 = vrot.slane %v2272_v50, %v2503_v5  ;;  %v1689_v63 = vcombine.high %v3054_v3, %v3054_v3 }
 0x129   : > { %1068 = vmatpush1.bf16.msra.mxu0 %v1026_v62 }
 0x12a   : > { %v975_v2 = vpop.permute.xlu0 %974  ;;  %v981_v10 = vpop.permute.xlu1 %980  ;;  %v3083_v19 = vcombine.low %v3061_v49, %v3061_v49  ;;  %v3113_v48 = vcombine.high %v3061_v49, %v3061_v49 }
 0x12b   : > { %v977_v20 = vsel %vm217_vm9, %v973_v60, %v975_v2 }
 0x12c   : > { %1492 = vrot.lane.b32.xlu0 %v1459_v26, %s2473_s22  ;;  %1500 = vrot.lane.b32.xlu1 %v2941_v30, %s2474_s23 }
 0x12e   : > { %v983_v6 = vpop.permute.xlu0 %982  ;;  %v971_v8 = vpop.permute.xlu1 %970 }
 0x12f   : > { %v985_v29 = vsel %vm226_vm7, %v981_v10, %v983_v6  ;;  %v1042_v25 = vsel %vm256_vm2, %v975_v2, %v983_v6  ;;  %v976_v40 = vsel %vm217_vm9, %v971_v8, %v973_v60 }
 0x130   : > { %1502 = vrot.lane.b32.xlu0 %v2993_v28, %s2474_s23  ;;  %1504 = vrot.lane.b32.xlu1 %v2949_v56, %s2474_s23  ;;  %v1039_v22 = vsel %vm256_vm2, %v977_v20, %v985_v29 }
 0x132   : > { %v979_v11 = vpop.permute.xlu0 %978  ;;  %v989_v12 = vpop.permute.xlu1 %988 }
 0x133   : > { %v984_v7 = vsel %vm226_vm7, %v979_v11, %v981_v10 }
 0x134   : > { %1692 = vrot.lane.b32.xlu0 %v1689_v63, %s2467_s17  ;;  %1694 = vrot.lane.b32.xlu1 %v3061_v49, %s2467_s17  ;;  %v1036_v39 = vsel %vm256_vm2, %v976_v40, %v984_v7 }
 0x136   : > { %v991_v15 = vpop.permute.xlu0 %990  ;;  %v987_v24 = vpop.permute.xlu1 %986 }
 0x137   : > { %v993_v17 = vsel %vm235_vm8, %v989_v12, %v991_v15  ;;  %v1048_v26 = vsel %vm266_vm5, %v1042_v25, %v991_v15  ;;  %v992_v37 = vsel %vm235_vm8, %v987_v24, %v989_v12 }
 0x138   : > { %1690 = vrot.lane.b32.xlu0 %v3054_v3, %s2467_s17  ;;  %1702 = vrot.lane.b32.xlu1 %v3061_v49, %s2466_s16  ;;  %v1046_v35 = vsel %vm266_vm5, %v1039_v22, %v993_v17  ;;  %v1044_v43 = vsel %vm266_vm5, %v1036_v39, %v992_v37 }
 0x13a   : > { %v997_v21 = vpop.permute.xlu0 %996  ;;  %v999_v31 = vpop.permute.xlu1 %998 }
 0x13b   : > { %v1001_v32 = vsel %vm244_vm10, %v997_v21, %v999_v31  ;;  %v1056_v34 = vsel %vm273_vm6, %v1048_v26, %v999_v31 }
 0x13c   : > { %1704 = vrot.lane.b32.xlu0 %v3079_v18, %s2466_s16  ;;  %1700 = vrot.lane.b32.xlu1 %v3083_v19, %s2466_s16  ;;  %v1053_v36 = vsel %vm273_vm6, %v1046_v35, %v1001_v32 }
 0x13d   : > { %2371 = vmatpush3.bf16.msra.mxu1 %v1056_v34  ;;  %1069 = vmatprep.subr.bf16.mxu0 %v1053_v36 }
 0x13e   : > { %v995_v41 = vpop.permute.xlu0 %994  ;;  %v1003_v42 = vpop.permute.xlu1 %1002  ;;  %2372 = vmatprep.subr.bf16.mxu1 %v2468_v14 }
 0x13f   : > { %v1000_v46 = vsel %vm244_vm10, %v995_v41, %v997_v21 }
 0x140   : > { %1711 = vrot.lane.b32.xlu0 %v3054_v3, %s2469_s18  ;;  %1713 = vrot.lane.b32.xlu1 %v3083_v19, %s2469_s18  ;;  %v1050_v44 = vsel %vm273_vm6, %v1044_v43, %v1000_v46 }
 0x141   : > { %1070 = vmatpush1.bf16.msra.mxu0 %v1050_v44 }
 0x142   : > { %v1005_v33 = vpop.permute.xlu0 %1004  ;;  %v1007_v51 = vpop.permute.xlu1 %1006 }
 0x143   : > { %v1008_v52 = vsel %vm253_vm11, %v1003_v42, %v1005_v33  ;;  %v1009_v45 = vsel %vm253_vm11, %v1005_v33, %v1007_v51  ;;  %v1065_v53 = vsel %vm256_vm2, %v1007_v51, 0 }
 0x144   : > { %v1059_v54 = vsel %vm256_vm2, %v1008_v52, 0  ;;  %1709 = vrot.lane.b32.xlu0 %v1708_v47, %s2469_s18  ;;  %1719 = vrot.lane.b32.xlu1 %v3113_v48, %s2470_s19 }
 0x145   : > { %2249 = vmatprep.subr.msk.bf16.mxu0 %vm256_vm2, %v1009_v45  ;;  %2373 = vmatpush3.bf16.msra.mxu1 %v1065_v53 }
 0x146   : > { %1072 = vmatpush1.bf16.msra.mxu0 %v1059_v54  ;;  %v1195_v55 = vpop.permute.xlu0 %1194  ;;  %v1197_v16 = vpop.permute.xlu1 %1196  ;;  %2378 = vmatprep.subr.bf16.mxu1 %v2468_v14 }
 0x147   : > { %v1199_v61 = vsel %vm187_vm1, %v1195_v55, %v1197_v16  ;;  %v1267_v62 = vsel %vm256_vm2, %v2829_v38, %v1197_v16 }
 0x148   : > { %1721 = vrot.lane.b32.xlu0 %v3069_v13, %s2470_s19  ;;  %1727 = vrot.lane.b32.xlu1 %v1689_v63, %s2471_s20  ;;  %v1264_v1 = vsel %vm256_vm2, %v2873_v4, %v1199_v61  ;;  %v2280_v4 = vld [vmem:[%s2508_s15 + $0x2a] sm:$0x3f] }
 0x149   : > { %2375 = vmatmul.mubr.msk.bf16.vlgmr.msra.gmra.mrb[12].mxu1 %vm307_vm12, %v2760_v59  ;;  %2250 = vmatmul.mubr.msk.bf16.vlgmr.msra.gmra.mrb[12].mxu0 %vm307_vm12, %v2760_v59  ;;  %v1930_v25 = vcombine.low %v2280_v4, %v2280_v4  ;;  %v1914_v7 = vcombine.high %v2280_v4, %v2280_v4 }
 0x14a   : > { %v1193_v50 = vpop.permute.xlu0 %1192  ;;  %v1205_v57 = vpop.permute.xlu1 %1204  ;;  %2384 = vmatprep.mubr.msk.bf16.mxu1 %vm2475_vm0, %v2468_v14  ;;  %1348 = vmatprep.mubr.bf16.mxu0 %v2476_v27 }
 0x14b   : > { %v1198_v8 = vsel %vm187_vm1, %v1193_v50, %v1195_v55  ;;  %v3174_v26 = vrot.slane %v1930_v25, %v2503_v5  ;;  %v3189_v35 = vrot.slane %v1914_v7, %v2503_v5 }
 0x14c   : > { %1729 = vrot.lane.b32.xlu0 %v3061_v49, %s2471_s20  ;;  %1717 = vrot.lane.b32.xlu1 %v3061_v49, %s2470_s19  ;;  %v1261_v15 = vsel %vm256_vm2, %v2821_v23, %v1198_v8 }
 0x14d   : > { %v3199_v41 = vcombine.low %v3189_v35, %v3189_v35 }
 0x14e   : > { %v1207_v58 = vpop.permute.xlu0 %1206  ;;  %v1203_v60 = vpop.permute.xlu1 %1202 }
 0x14f   : > { %v1209_v0 = vsel %vm198_vm3, %v1205_v57, %v1207_v58  ;;  %v1273_v2 = vsel %vm266_vm5, %v1267_v62, %v1207_v58  ;;  %v1208_v12 = vsel %vm198_vm3, %v1203_v60, %v1205_v57  ;;  %v1957_v62 = vcombine.low %v3174_v26, %v3174_v26 }
 0x150   : > { %1725 = vrot.lane.b32.xlu0 %v3054_v3, %s2471_s20  ;;  %1735 = vrot.lane.b32.xlu1 %v3061_v49, %s2472_s21  ;;  %v1271_v11 = vsel %vm266_vm5, %v1264_v1, %v1209_v0  ;;  %v1269_v17 = vsel %vm266_vm5, %v1261_v15, %v1208_v12 }
 0x152   : > { %v1214_v10 = vpop.permute.xlu0 %1213  ;;  %v1216_v6 = vpop.permute.xlu1 %1215 }
 0x153   : > { %v1218_v63 = vsel %vm208_vm4, %v1214_v10, %v1216_v6  ;;  %v1281_v9 = vsel %vm273_vm6, %v1273_v2, %v1216_v6 }
 0x154   : > { %1737 = vrot.lane.b32.xlu0 %v3079_v18, %s2472_s21  ;;  %1733 = vrot.lane.b32.xlu1 %v3083_v19, %s2472_s21  ;;  %v1278_v38 = vsel %vm273_vm6, %v1271_v11, %v1218_v63 }
 0x155   : > { %2379 = vmatpush3.bf16.msra.mxu1 %v1281_v9  ;;  %1316 = vmatprep.subr.bf16.mxu0 %v1278_v38 }
 0x156   : > { %v1212_v24 = vpop.permute.xlu0 %1211  ;;  %v1222_v29 = vpop.permute.xlu1 %1221  ;;  %2380 = vmatprep.subr.bf16.mxu1 %v2468_v14 }
 0x157   : > { %v1217_v20 = vsel %vm208_vm4, %v1212_v24, %v1214_v10 }
 0x158   : > { %1743 = vrot.lane.b32.xlu0 %v3054_v3, %s2473_s22  ;;  %1745 = vrot.lane.b32.xlu1 %v3083_v19, %s2473_s22  ;;  %v1275_v18 = vsel %vm273_vm6, %v1269_v17, %v1217_v20  ;;  %v3181_v3 = vrot.slane %v2280_v4, %v2503_v5  ;;  %v1938_v19 = vcombine.high %v3174_v26, %v3174_v26 }
 0x159   : > { %1317 = vmatpush1.bf16.msra.mxu0 %v1275_v18 }
 0x15a   : > { %v1224_v22 = vpop.permute.xlu0 %1223  ;;  %v1230_v23 = vpop.permute.xlu1 %1229  ;;  %v3203_v5 = vcombine.low %v3181_v3, %v3181_v3  ;;  %v3233_v1 = vcombine.high %v3181_v3, %v3181_v3 }
 0x15b   : > { %v1226_v42 = vsel %vm217_vm9, %v1222_v29, %v1224_v22 }
 0x15c   : > { %1741 = vrot.lane.b32.xlu0 %v1708_v47, %s2473_s22  ;;  %1749 = vrot.lane.b32.xlu1 %v3061_v49, %s2474_s23 }
 0x15e   : > { %v1232_v21 = vpop.permute.xlu0 %1231  ;;  %v1220_v31 = vpop.permute.xlu1 %1219 }
 0x15f   : > { %v1234_v40 = vsel %vm226_vm7, %v1230_v23, %v1232_v21  ;;  %v1291_v43 = vsel %vm256_vm2, %v1224_v22, %v1232_v21  ;;  %v1225_v16 = vsel %vm217_vm9, %v1220_v31, %v1222_v29 }
 0x160   : > { %1751 = vrot.lane.b32.xlu0 %v3113_v48, %s2474_s23  ;;  %1753 = vrot.lane.b32.xlu1 %v3069_v13, %s2474_s23  ;;  %v1288_v46 = vsel %vm256_vm2, %v1226_v42, %v1234_v40 }
 0x162   : > { %v1228_v32 = vpop.permute.xlu0 %1227  ;;  %v1238_v34 = vpop.permute.xlu1 %1237 }
 0x163   : > { %v1233_v51 = vsel %vm226_vm7, %v1228_v32, %v1230_v23 }
 0x164   : > { %1941 = vrot.lane.b32.xlu0 %v1938_v19, %s2467_s17  ;;  %1943 = vrot.lane.b32.xlu1 %v3181_v3, %s2467_s17  ;;  %v1285_v50 = vsel %vm256_vm2, %v1225_v16, %v1233_v51 }
 0x166   : > { %v1240_v37 = vpop.permute.xlu0 %1239  ;;  %v1236_v36 = vpop.permute.xlu1 %1235 }
 0x167   : > { %v1242_v39 = vsel %vm235_vm8, %v1238_v34, %v1240_v37  ;;  %v1297_v44 = vsel %vm266_vm5, %v1291_v43, %v1240_v37  ;;  %v1241_v54 = vsel %vm235_vm8, %v1236_v36, %v1238_v34 }
 0x168   : > { %1939 = vrot.lane.b32.xlu0 %v3174_v26, %s2467_s17  ;;  %1951 = vrot.lane.b32.xlu1 %v3181_v3, %s2466_s16  ;;  %v1295_v53 = vsel %vm266_vm5, %v1288_v46, %v1242_v39  ;;  %v1293_v60 = vsel %vm266_vm5, %v1285_v50, %v1241_v54 }
 0x16a   : > { %v1246_v47 = vpop.permute.xlu0 %1245  ;;  %v1248_v33 = vpop.permute.xlu1 %1247 }
 0x16b   : > { %v1250_v52 = vsel %vm244_vm10, %v1246_v47, %v1248_v33  ;;  %v1305_v45 = vsel %vm273_vm6, %v1297_v44, %v1248_v33 }
 0x16c   : > { %1953 = vrot.lane.b32.xlu0 %v3199_v41, %s2466_s16  ;;  %1949 = vrot.lane.b32.xlu1 %v3203_v5, %s2466_s16  ;;  %v1302_v55 = vsel %vm273_vm6, %v1295_v53, %v1250_v52 }
 0x16d   : > { %2381 = vmatpush3.bf16.msra.mxu1 %v1305_v45  ;;  %1318 = vmatprep.subr.bf16.mxu0 %v1302_v55 }
 0x16e   : > { %v1244_v57 = vpop.permute.xlu0 %1243  ;;  %v1252_v58 = vpop.permute.xlu1 %1251  ;;  %2382 = vmatprep.subr.bf16.mxu1 %v2468_v14 }
 0x16f   : > { %v1249_v61 = vsel %vm244_vm10, %v1244_v57, %v1246_v47 }
 0x170   : > { %1960 = vrot.lane.b32.xlu0 %v3174_v26, %s2469_s18  ;;  %1962 = vrot.lane.b32.xlu1 %v3203_v5, %s2469_s18  ;;  %v1299_v0 = vsel %vm273_vm6, %v1293_v60, %v1249_v61 }
 0x171   : > { %1319 = vmatpush1.bf16.msra.mxu0 %v1299_v0 }
 0x172   : > { %v1254_v2 = vpop.permute.xlu0 %1253  ;;  %v1256_v10 = vpop.permute.xlu1 %1255 }
 0x173   : > { %v1257_v6 = vsel %vm253_vm11, %v1252_v58, %v1254_v2  ;;  %v1258_v8 = vsel %vm253_vm11, %v1254_v2, %v1256_v10  ;;  %v1314_v63 = vsel %vm256_vm2, %v1256_v10, 0 }
 0x174   : > { %v1308_v9 = vsel %vm256_vm2, %v1257_v6, 0  ;;  %1958 = vrot.lane.b32.xlu0 %v1957_v62, %s2469_s18  ;;  %1968 = vrot.lane.b32.xlu1 %v3233_v1, %s2470_s19 }
 0x175   : > { %2257 = vmatprep.subr.msk.bf16.mxu0 %vm256_vm2, %v1258_v8  ;;  %2383 = vmatpush3.bf16.msra.mxu1 %v1314_v63 }
 0x176   : > { %1321 = vmatpush1.bf16.msra.mxu0 %v1308_v9  ;;  %v1444_v11 = vpop.permute.xlu0 %1443  ;;  %v1446_v12 = vpop.permute.xlu1 %1445  ;;  %2388 = vmatprep.subr.bf16.mxu1 %v2468_v14 }
 0x177   : > { %v1448_v29 = vsel %vm187_vm1, %v1444_v11, %v1446_v12 }
 0x178   : > { %1970 = vrot.lane.b32.xlu0 %v3189_v35, %s2470_s19  ;;  %1976 = vrot.lane.b32.xlu1 %v1938_v19, %s2471_s20  ;;  %v1513_v20 = vsel %vm256_vm2, %v2993_v28, %v1448_v29 }
 0x179   : > { %2385 = vmatmul.mubr.msk.bf16.vlgmr.msra.gmra.mrb[16].mxu1 %vm307_vm12, %v2760_v59  ;;  %2258 = vmatmul.mubr.msk.bf16.vlgmr.msra.gmra.mrb[16].mxu0 %vm307_vm12, %v2760_v59  ;;  %v1516_v59 = vsel %vm256_vm2, %v2949_v56, %v1446_v12 }
 0x17a   : > { %v1442_v38 = vpop.permute.xlu0 %1441  ;;  %v1454_v4 = vpop.permute.xlu1 %1453  ;;  %2394 = vmatprep.mubr.msk.bf16.mxu1 %vm2475_vm0, %v2468_v14  ;;  %1597 = vmatprep.mubr.bf16.mxu0 %v2476_v27 }
 0x17b   : > { %v1447_v23 = vsel %vm187_vm1, %v1442_v38, %v1444_v11 }
 0x17c   : > { %1978 = vrot.lane.b32.xlu0 %v3181_v3, %s2471_s20  ;;  %1966 = vrot.lane.b32.xlu1 %v3181_v3, %s2470_s19  ;;  %v1510_v28 = vsel %vm256_vm2, %v2941_v30, %v1447_v23 }
 0x17e   : > { %v1456_v15 = vpop.permute.xlu0 %1455  ;;  %v1452_v24 = vpop.permute.xlu1 %1451 }
 0x17f   : > { %v1458_v17 = vsel %vm198_vm3, %v1454_v4, %v1456_v15  ;;  %v1522_v18 = vsel %vm266_vm5, %v1516_v59, %v1456_v15  ;;  %v1457_v7 = vsel %vm198_vm3, %v1452_v24, %v1454_v4 }
 0x180   : > { %1974 = vrot.lane.b32.xlu0 %v3174_v26, %s2471_s20  ;;  %1984 = vrot.lane.b32.xlu1 %v3181_v3, %s2472_s21  ;;  %v1520_v19 = vsel %vm266_vm5, %v1513_v20, %v1458_v17  ;;  %v1518_v37 = vsel %vm266_vm5, %v1510_v28, %v1457_v7 }
 0x182   : > { %v1463_v25 = vpop.permute.xlu0 %1462  ;;  %v1465_v22 = vpop.permute.xlu1 %1464 }
 0x183   : > { %v1467_v21 = vsel %vm208_vm4, %v1463_v25, %v1465_v22  ;;  %v1530_v31 = vsel %vm273_vm6, %v1522_v18, %v1465_v22 }
 0x184   : > { %1986 = vrot.lane.b32.xlu0 %v3199_v41, %s2472_s21  ;;  %1982 = vrot.lane.b32.xlu1 %v3203_v5, %s2472_s21  ;;  %v1527_v56 = vsel %vm273_vm6, %v1520_v19, %v1467_v21  ;;  %v3332_v19 = vld [vmem:[%s3461_s0] sm:$0xf] }
 0x185   : > { %2389 = vmatpush3.bf16.msra.mxu1 %v1530_v31  ;;  %1565 = vmatprep.subr.bf16.mxu0 %v1527_v56 }
 0x186   : > { %v1461_v32 = vpop.permute.xlu0 %1460  ;;  %v1471_v34 = vpop.permute.xlu1 %1470  ;;  %2390 = vmatprep.subr.bf16.mxu1 %v2468_v14 }
 0x187   : > { %v1466_v36 = vsel %vm208_vm4, %v1461_v32, %v1463_v25 }
 0x188   : > { %1992 = vrot.lane.b32.xlu0 %v3174_v26, %s2473_s22  ;;  %1994 = vrot.lane.b32.xlu1 %v3203_v5, %s2473_s22  ;;  %v1524_v40 = vsel %vm273_vm6, %v1518_v37, %v1466_v36 }
 0x189   : > { %1566 = vmatpush1.bf16.msra.mxu0 %v1524_v40 }
 0x18a   : > { %v1473_v39 = vpop.permute.xlu0 %1472  ;;  %v1479_v30 = vpop.permute.xlu1 %1478 }
 0x18b   : > { %v1475_v58 = vsel %vm217_vm9, %v1471_v34, %v1473_v39 }
 0x18c   : > { %1990 = vrot.lane.b32.xlu0 %v1957_v62, %s2473_s22  ;;  %1998 = vrot.lane.b32.xlu1 %v3181_v3, %s2474_s23  ;;  %v354_v26 = vpop.f32.mrb[0].mxu0  ;;  %v395_v41 = vpop.f32.mrb[0].mxu1 }
 0x18d   : > { %v356_v5 = vpop.f32.mrb[1].mxu0  ;;  %v2291_v42 = vpack.c.bf16 %v395_v41, %v395_v41  ;;  %v2346_v43 = vpop.f32.mrb[1].mxu1 }
 0x18e   : > { %v1481_v46 = vpop.permute.xlu0 %1480  ;;  %v1469_v44 = vpop.permute.xlu1 %1468  ;;  %v2290_v47 = vpack.c.bf16 %v356_v5, %v354_v26 }
 0x18f   : > { %416 = vst.msk [vmem:[%s3293_s29 + $0x8] sm:$0xf] %vm415_vm13, %v2291_v42  ;;  %v358_v33 = vpop.f32.mrb[2].mxu0  ;;  %v398_v51 = vpop.f32.mrb[2].mxu1  ;;  %v1483_v50 = vsel %vm226_vm7, %v1479_v30, %v1481_v46  ;;  %v1540_v60 = vsel %vm256_vm2, %v1473_v39, %v1481_v46  ;;  %v1474_v12 = vsel %vm217_vm9, %v1469_v44, %v1471_v34 }
 0x190   : > { %2000 = vrot.lane.b32.xlu0 %v3233_v1, %s2474_s23  ;;  %2002 = vrot.lane.b32.xlu1 %v3189_v35, %s2474_s23  ;;  %414 = vst [vmem:[%s3293_s29] sm:$0xff] %v2290_v47  ;;  %v359_v52 = vpop.f32.mrb[3].mxu0  ;;  %v2347_v45 = vpop.f32.mrb[3].mxu1  ;;  %v1537_v61 = vsel %vm256_vm2, %v1475_v58, %v1483_v50 }
 0x192   : > { %v1477_v53 = vpop.permute.xlu0 %1476  ;;  %v1487_v54 = vpop.permute.xlu1 %1486 }
 0x193   : > { %v1482_v10 = vsel %vm226_vm7, %v1477_v53, %v1479_v30 }
 0x194   : > { %v1534_v38 = vsel %vm256_vm2, %v1474_v12, %v1482_v10 }
 0x196   : > { %v1489_v55 = vpop.permute.xlu0 %1488  ;;  %v1485_v16 = vpop.permute.xlu1 %1484 }
 0x197   : > { %v1491_v57 = vsel %vm235_vm8, %v1487_v54, %v1489_v55  ;;  %v1546_v0 = vsel %vm266_vm5, %v1540_v60, %v1489_v55  ;;  %v1490_v9 = vsel %vm235_vm8, %v1485_v16, %v1487_v54 }
 0x198   : > { %v1544_v63 = vsel %vm266_vm5, %v1537_v61, %v1491_v57  ;;  %v1542_v24 = vsel %vm266_vm5, %v1534_v38, %v1490_v9 }
 0x19a   : > { %v1495_v62 = vpop.permute.xlu0 %1494  ;;  %v1497_v2 = vpop.permute.xlu1 %1496 }
 0x19b   : > { %v1499_v6 = vsel %vm244_vm10, %v1495_v62, %v1497_v2  ;;  %v1554_v8 = vsel %vm273_vm6, %v1546_v0, %v1497_v2 }
 0x19c   : > { %2391 = vmatpush3.bf16.msra.mxu1 %v1554_v8  ;;  %v1551_v11 = vsel %vm273_vm6, %v1544_v63, %v1499_v6 }
 0x19d   : > { %1567 = vmatprep.subr.bf16.mxu0 %v1551_v11  ;;  %2392 = vmatprep.subr.bf16.mxu1 %v2468_v14 }
 0x19e   : > { %v1493_v4 = vpop.permute.xlu0 %1492  ;;  %v1501_v15 = vpop.permute.xlu1 %1500 }
 0x19f   : > { %v1498_v29 = vsel %vm244_vm10, %v1493_v4, %v1495_v62 }
 0x1a0   : > { %v1548_v17 = vsel %vm273_vm6, %v1542_v24, %v1498_v29 }
 0x1a1   : > { %1568 = vmatpush1.bf16.msra.mxu0 %v1548_v17 }
 0x1a2   : > { %v1503_v59 = vpop.permute.xlu0 %1502  ;;  %v1505_v20 = vpop.permute.xlu1 %1504 }
 0x1a3   : > { %v1506_v18 = vsel %vm253_vm11, %v1501_v15, %v1503_v59  ;;  %v1507_v25 = vsel %vm253_vm11, %v1503_v59, %v1505_v20  ;;  %v1563_v22 = vsel %vm256_vm2, %v1505_v20, 0 }
 0x1a4   : > { %v1557_v23 = vsel %vm256_vm2, %v1506_v18, 0  ;;  %2265 = vmatprep.subr.msk.bf16.mxu0 %vm256_vm2, %v1507_v25  ;;  %2393 = vmatpush3.bf16.msra.mxu1 %v1563_v22 }
 0x1a5   : > { %1570 = vmatpush1.bf16.msra.mxu0 %v1557_v23  ;;  %2398 = vmatprep.subr.bf16.mxu1 %v2468_v14 }
 0x1a6   : > { %v1693_v21 = vpop.permute.xlu0 %1692  ;;  %v1695_v31 = vpop.permute.xlu1 %1694 }
 0x1a7   : > { %2395 = vmatmul.mubr.msk.bf16.vlgmr.msra.gmra.mrb[20].mxu1 %vm307_vm12, %v3332_v19  ;;  %v1697_v34 = vsel %vm187_vm1, %v1693_v21, %v1695_v31  ;;  %v1765_v36 = vsel %vm256_vm2, %v3069_v13, %v1695_v31 }
 0x1a8   : > { %2266 = vmatmul.mubr.msk.bf16.vlgmr.msra.gmra.mrb[20].mxu0 %vm307_vm12, %v3332_v19  ;;  %2404 = vmatprep.mubr.msk.bf16.mxu1 %vm2475_vm0, %v2468_v14  ;;  %v1762_v40 = vsel %vm256_vm2, %v3113_v48, %v1697_v34 }
 0x1a9   : > { %1846 = vmatprep.mubr.bf16.mxu0 %v2476_v27 }
 0x1aa   : > { %v1691_v7 = vpop.permute.xlu0 %1690  ;;  %v1703_v56 = vpop.permute.xlu1 %1702 }
 0x1ab   : > { %v1696_v41 = vsel %vm187_vm1, %v1691_v7, %v1693_v21 }
 0x1ac   : > { %v1759_v48 = vsel %vm256_vm2, %v3061_v49, %v1696_v41 }
 0x1ae   : > { %v1705_v28 = vpop.permute.xlu0 %1704  ;;  %v1701_v32 = vpop.permute.xlu1 %1700 }
 0x1af   : > { %v1707_v37 = vsel %vm198_vm3, %v1703_v56, %v1705_v28  ;;  %v1771_v39 = vsel %vm266_vm5, %v1765_v36, %v1705_v28  ;;  %v1706_v46 = vsel %vm198_vm3, %v1701_v32, %v1703_v56 }
 0x1b0   : > { %v1769_v43 = vsel %vm266_vm5, %v1762_v40, %v1707_v37  ;;  %v1767_v33 = vsel %vm266_vm5, %v1759_v48, %v1706_v46 }
 0x1b2   : > { %v1712_v30 = vpop.permute.xlu0 %1711  ;;  %v1714_v26 = vpop.permute.xlu1 %1713 }
 0x1b3   : > { %v1716_v5 = vsel %vm208_vm4, %v1712_v30, %v1714_v26  ;;  %v1779_v42 = vsel %vm273_vm6, %v1771_v39, %v1714_v26 }
 0x1b4   : > { %2399 = vmatpush3.bf16.msra.mxu1 %v1779_v42  ;;  %v1776_v13 = vsel %vm273_vm6, %v1769_v43, %v1716_v5 }
 0x1b5   : > { %1814 = vmatprep.subr.bf16.mxu0 %v1776_v13  ;;  %2400 = vmatprep.subr.bf16.mxu1 %v2468_v14 }
 0x1b6   : > { %v1710_v44 = vpop.permute.xlu0 %1709  ;;  %v1720_v47 = vpop.permute.xlu1 %1719 }
 0x1b7   : > { %v1715_v51 = vsel %vm208_vm4, %v1710_v44, %v1712_v30 }
 0x1b8   : > { %v1773_v52 = vsel %vm273_vm6, %v1767_v33, %v1715_v51 }
 0x1b9   : > { %1815 = vmatpush1.bf16.msra.mxu0 %v1773_v52 }
 0x1ba   : > { %v1722_v45 = vpop.permute.xlu0 %1721  ;;  %v1728_v53 = vpop.permute.xlu1 %1727 }
 0x1bb   : > { %v1724_v12 = vsel %vm217_vm9, %v1720_v47, %v1722_v45 }
 0x1bc   : > { %v603_v54 = vpop.f32.mrb[4].mxu0  ;;  %v644_v55 = vpop.f32.mrb[4].mxu1 }
 0x1bd   : > { %v605_v16 = vpop.f32.mrb[5].mxu0  ;;  %v2293_v50 = vpack.c.bf16 %v644_v55, %v644_v55  ;;  %v2356_v57 = vpop.f32.mrb[5].mxu1 }
 0x1be   : > { %v1730_v58 = vpop.permute.xlu0 %1729  ;;  %v1718_v49 = vpop.permute.xlu1 %1717  ;;  %v2292_v60 = vpack.c.bf16 %v605_v16, %v603_v54 }
 0x1bf   : > { %2239 = vst.msk [vmem:[%s3293_s29 + $0x14] sm:$0xf] %vm415_vm13, %v2293_v50  ;;  %v607_v61 = vpop.f32.mrb[6].mxu0  ;;  %v647_v0 = vpop.f32.mrb[6].mxu1  ;;  %v1732_v9 = vsel %vm226_vm7, %v1728_v53, %v1730_v58  ;;  %v1789_v38 = vsel %vm256_vm2, %v1722_v45, %v1730_v58  ;;  %v1723_v23 = vsel %vm217_vm9, %v1718_v49, %v1720_v47 }
 0x1c0   : > { %2238 = vst [vmem:[%s3293_s29 + $0xc] sm:$0xff] %v2292_v60  ;;  %v608_v62 = vpop.f32.mrb[7].mxu0  ;;  %v2357_v2 = vpop.f32.mrb[7].mxu1  ;;  %v1786_v4 = vsel %vm256_vm2, %v1724_v12, %v1732_v9 }
 0x1c2   : > { %v1726_v10 = vpop.permute.xlu0 %1725  ;;  %v1736_v6 = vpop.permute.xlu1 %1735 }
 0x1c3   : > { %v1731_v17 = vsel %vm226_vm7, %v1726_v10, %v1728_v53 }
 0x1c4   : > { %v1783_v21 = vsel %vm256_vm2, %v1723_v23, %v1731_v17 }
 0x1c6   : > { %v1738_v8 = vpop.permute.xlu0 %1737  ;;  %v1734_v63 = vpop.permute.xlu1 %1733 }
 0x1c7   : > { %v1740_v11 = vsel %vm235_vm8, %v1736_v6, %v1738_v8  ;;  %v1795_v15 = vsel %vm266_vm5, %v1789_v38, %v1738_v8  ;;  %v1739_v25 = vsel %vm235_vm8, %v1734_v63, %v1736_v6 }
 0x1c8   : > { %v1793_v18 = vsel %vm266_vm5, %v1786_v4, %v1740_v11  ;;  %v1791_v56 = vsel %vm266_vm5, %v1783_v21, %v1739_v25 }
 0x1ca   : > { %v1744_v24 = vpop.permute.xlu0 %1743  ;;  %v1746_v29 = vpop.permute.xlu1 %1745 }
 0x1cb   : > { %v1748_v59 = vsel %vm244_vm10, %v1744_v24, %v1746_v29  ;;  %v1803_v20 = vsel %vm273_vm6, %v1795_v15, %v1746_v29 }
 0x1cc   : > { %2401 = vmatpush3.bf16.msra.mxu1 %v1803_v20  ;;  %v1800_v22 = vsel %vm273_vm6, %v1793_v18, %v1748_v59 }
 0x1cd   : > { %1816 = vmatprep.subr.bf16.mxu0 %v1800_v22  ;;  %2402 = vmatprep.subr.bf16.mxu1 %v2468_v14 }
 0x1ce   : > { %v1742_v31 = vpop.permute.xlu0 %1741  ;;  %v1750_v7 = vpop.permute.xlu1 %1749 }
 0x1cf   : > { %v1747_v28 = vsel %vm244_vm10, %v1742_v31, %v1744_v24 }
 0x1d0   : > { %v1797_v32 = vsel %vm273_vm6, %v1791_v56, %v1747_v28 }
 0x1d1   : > { %1817 = vmatpush1.bf16.msra.mxu0 %v1797_v32 }
 0x1d2   : > { %v1752_v34 = vpop.permute.xlu0 %1751  ;;  %v1754_v37 = vpop.permute.xlu1 %1753 }
 0x1d3   : > { %v1755_v36 = vsel %vm253_vm11, %v1750_v7, %v1752_v34  ;;  %v1756_v40 = vsel %vm253_vm11, %v1752_v34, %v1754_v37  ;;  %v1812_v39 = vsel %vm256_vm2, %v1754_v37, 0 }
 0x1d4   : > { %v1806_v30 = vsel %vm256_vm2, %v1755_v36, 0  ;;  %2273 = vmatprep.subr.msk.bf16.mxu0 %vm256_vm2, %v1756_v40  ;;  %2403 = vmatpush3.bf16.msra.mxu1 %v1812_v39 }
 0x1d5   : > { %1819 = vmatpush1.bf16.msra.mxu0 %v1806_v30  ;;  %2408 = vmatprep.subr.bf16.mxu1 %v2468_v14 }
 0x1d6   : > { %v1942_v26 = vpop.permute.xlu0 %1941  ;;  %v1944_v41 = vpop.permute.xlu1 %1943 }
 0x1d7   : > { %2405 = vmatmul.mubr.msk.bf16.vlgmr.msra.gmra.mrb[24].mxu1 %vm307_vm12, %v3332_v19  ;;  %v1946_v13 = vsel %vm187_vm1, %v1942_v26, %v1944_v41  ;;  %v2014_v44 = vsel %vm256_vm2, %v3189_v35, %v1944_v41 }
 0x1d8   : > { %2274 = vmatmul.mubr.msk.bf16.vlgmr.msra.gmra.mrb[24].mxu0 %vm307_vm12, %v3332_v19  ;;  %2414 = vmatprep.mubr.msk.bf16.mxu1 %vm2475_vm0, %v2468_v14  ;;  %v2011_v47 = vsel %vm256_vm2, %v3233_v1, %v1946_v13 }
 0x1d9   : > { %2095 = vmatprep.mubr.bf16.mxu0 %v2476_v27 }
 0x1da   : > { %v1940_v5 = vpop.permute.xlu0 %1939  ;;  %v1952_v42 = vpop.permute.xlu1 %1951 }
 0x1db   : > { %v1945_v27 = vsel %vm187_vm1, %v1940_v5, %v1942_v26 }
 0x1dc   : > { %v2008_v1 = vsel %vm256_vm2, %v3181_v3, %v1945_v27 }
 0x1de   : > { %v1954_v43 = vpop.permute.xlu0 %1953  ;;  %v1950_v46 = vpop.permute.xlu1 %1949 }
 0x1df   : > { %v1956_v48 = vsel %vm198_vm3, %v1952_v42, %v1954_v43  ;;  %v2020_v33 = vsel %vm266_vm5, %v2014_v44, %v1954_v43  ;;  %v1955_v55 = vsel %vm198_vm3, %v1950_v46, %v1952_v42 }
 0x1e0   : > { %v2018_v54 = vsel %vm266_vm5, %v2011_v47, %v1956_v48  ;;  %v2016_v57 = vsel %vm266_vm5, %v2008_v1, %v1955_v55 }
 0x1e2   : > { %v1961_v51 = vpop.permute.xlu0 %1960  ;;  %v1963_v52 = vpop.permute.xlu1 %1962 }
 0x1e3   : > { %v1965_v45 = vsel %vm208_vm4, %v1961_v51, %v1963_v52  ;;  %v2028_v53 = vsel %vm273_vm6, %v2020_v33, %v1963_v52 }
 0x1e4   : > { %2409 = vmatpush3.bf16.msra.mxu1 %v2028_v53  ;;  %v2025_v35 = vsel %vm273_vm6, %v2018_v54, %v1965_v45 }
 0x1e5   : > { %2063 = vmatprep.subr.bf16.mxu0 %v2025_v35  ;;  %2410 = vmatprep.subr.bf16.mxu1 %v2468_v14 }
 0x1e6   : > { %v1959_v16 = vpop.permute.xlu0 %1958  ;;  %v1969_v50 = vpop.permute.xlu1 %1968 }
 0x1e7   : > { %v1964_v58 = vsel %vm208_vm4, %v1959_v16, %v1961_v51 }
 0x1e8   : > { %v2022_v49 = vsel %vm273_vm6, %v2016_v57, %v1964_v58 }
 0x1e9   : > { %2064 = vmatpush1.bf16.msra.mxu0 %v2022_v49 }
 0x1ea   : > { %v1971_v60 = vpop.permute.xlu0 %1970  ;;  %v1977_v61 = vpop.permute.xlu1 %1976 }
 0x1eb   : > { %v1973_v20 = vsel %vm217_vm9, %v1969_v50, %v1971_v60 }
 0x1ec   : > { %v852_v0 = vpop.f32.mrb[8].mxu0  ;;  %v893_v62 = vpop.f32.mrb[8].mxu1 }
 0x1ed   : > { %v854_v2 = vpop.f32.mrb[9].mxu0  ;;  %v2295_v10 = vpack.c.bf16 %v893_v62, %v893_v62  ;;  %v2366_v6 = vpop.f32.mrb[9].mxu1 }
 0x1ee   : > { %v1979_v8 = vpop.permute.xlu0 %1978  ;;  %v1967_v3 = vpop.permute.xlu1 %1966  ;;  %v2294_v63 = vpack.c.bf16 %v854_v2, %v852_v0 }
 0x1ef   : > { %2247 = vst.msk [vmem:[%s3293_s29 + $0x20] sm:$0xf] %vm415_vm13, %v2295_v10  ;;  %v856_v9 = vpop.f32.mrb[10].mxu0  ;;  %v896_v11 = vpop.f32.mrb[10].mxu1  ;;  %v1981_v17 = vsel %vm226_vm7, %v1977_v61, %v1979_v8  ;;  %v2038_v18 = vsel %vm256_vm2, %v1971_v60, %v1979_v8  ;;  %v1972_v37 = vsel %vm217_vm9, %v1967_v3, %v1969_v50 }
 0x1f0   : > { %2246 = vst [vmem:[%s3293_s29 + $0x18] sm:$0xff] %v2294_v63  ;;  %v857_v12 = vpop.f32.mrb[11].mxu0  ;;  %v2367_v38 = vpop.f32.mrb[11].mxu1  ;;  %v2035_v25 = vsel %vm256_vm2, %v1973_v20, %v1981_v17 }
 0x1f2   : > { %v1975_v4 = vpop.permute.xlu0 %1974  ;;  %v1985_v15 = vpop.permute.xlu1 %1984 }
 0x1f3   : > { %v1980_v31 = vsel %vm226_vm7, %v1975_v4, %v1977_v61 }
 0x1f4   : > { %v2032_v36 = vsel %vm256_vm2, %v1972_v37, %v1980_v31 }
 0x1f6   : > { %v1987_v24 = vpop.permute.xlu0 %1986  ;;  %v1983_v29 = vpop.permute.xlu1 %1982 }
 0x1f7   : > { %v1989_v59 = vsel %vm235_vm8, %v1985_v15, %v1987_v24  ;;  %v2044_v22 = vsel %vm266_vm5, %v2038_v18, %v1987_v24  ;;  %v1988_v32 = vsel %vm235_vm8, %v1983_v29, %v1985_v15 }
 0x1f8   : > { %v2042_v28 = vsel %vm266_vm5, %v2035_v25, %v1989_v59  ;;  %v2040_v30 = vsel %vm266_vm5, %v2032_v36, %v1988_v32 }
 0x1fa   : > { %v1993_v23 = vpop.permute.xlu0 %1992  ;;  %v1995_v21 = vpop.permute.xlu1 %1994 }
 0x1fb   : > { %v1997_v7 = vsel %vm244_vm10, %v1993_v23, %v1995_v21  ;;  %v2052_v56 = vsel %vm273_vm6, %v2044_v22, %v1995_v21 }
 0x1fc   : > { %2411 = vmatpush3.bf16.msra.mxu1 %v2052_v56  ;;  %v2049_v34 = vsel %vm273_vm6, %v2042_v28, %v1997_v7 }
 0x1fd   : > { %2065 = vmatprep.subr.bf16.mxu0 %v2049_v34  ;;  %2412 = vmatprep.subr.bf16.mxu1 %v2468_v14 }
 0x1fe   : > { %v1991_v40 = vpop.permute.xlu0 %1990  ;;  %v1999_v39 = vpop.permute.xlu1 %1998 }
 0x1ff   : > { %v1996_v26 = vsel %vm244_vm10, %v1991_v40, %v1993_v23 }
 0x200   : > { %v2046_v41 = vsel %vm273_vm6, %v2040_v30, %v1996_v26 }
 0x201   : > { %2066 = vmatpush1.bf16.msra.mxu0 %v2046_v41 }
 0x202   : > { %v2001_v5 = vpop.permute.xlu0 %2000  ;;  %v2003_v42 = vpop.permute.xlu1 %2002 }
 0x203   : > { %v2004_v43 = vsel %vm253_vm11, %v1999_v39, %v2001_v5  ;;  %v2005_v46 = vsel %vm253_vm11, %v2001_v5, %v2003_v42  ;;  %v2061_v14 = vsel %vm256_vm2, %v2003_v42, 0 }
 0x204   : > { %v2055_v13 = vsel %vm256_vm2, %v2004_v43, 0  ;;  %2281 = vmatprep.subr.msk.bf16.mxu0 %vm256_vm2, %v2005_v46  ;;  %2413 = vmatpush3.bf16.msra.mxu1 %v2061_v14 }
 0x205   : > { %2068 = vmatpush1.bf16.msra.mxu0 %v2055_v13 }
 0x207   : > { %2415 = vmatmul.mubr.msk.bf16.vlgmr.msra.gmra.mrb[28].mxu1 %vm307_vm12, %v3332_v19 }
 0x208   : > { %2282 = vmatmul.mubr.msk.bf16.vlgmr.msra.gmra.mrb[28].mxu0 %vm307_vm12, %v3332_v19 }
 0x21c   : > { %v1101_v48 = vpop.f32.mrb[12].mxu0  ;;  %v1142_v44 = vpop.f32.mrb[12].mxu1 }
 0x21d   : > { %v1103_v47 = vpop.f32.mrb[13].mxu0  ;;  %v2297_v33 = vpack.c.bf16 %v1142_v44, %v1142_v44  ;;  %v2376_v51 = vpop.f32.mrb[13].mxu1 }
 0x21e   : > { %v2296_v52 = vpack.c.bf16 %v1103_v47, %v1101_v48  ;;  %v1105_v27 = vpop.f32.mrb[14].mxu0  ;;  %v1145_v45 = vpop.f32.mrb[14].mxu1 }
 0x21f   : > { %2255 = vst.msk [vmem:[%s3293_s29 + $0x2c] sm:$0xf] %vm415_vm13, %v2297_v33  ;;  %v1106_v53 = vpop.f32.mrb[15].mxu0  ;;  %v2377_v54 = vpop.f32.mrb[15].mxu1 }
 0x220   : > { %2254 = vst [vmem:[%s3293_s29 + $0x24] sm:$0xff] %v2296_v52 }
 0x24c   : > { %v1350_v55 = vpop.f32.mrb[16].mxu0  ;;  %v1391_v35 = vpop.f32.mrb[16].mxu1 }
 0x24d   : > { %v1352_v1 = vpop.f32.mrb[17].mxu0  ;;  %v2299_v16 = vpack.c.bf16 %v1391_v35, %v1391_v35  ;;  %v2386_v19 = vpop.f32.mrb[17].mxu1 }
 0x24e   : > { %v2298_v50 = vpack.c.bf16 %v1352_v1, %v1350_v55  ;;  %v1354_v57 = vpop.f32.mrb[18].mxu0  ;;  %v1394_v58 = vpop.f32.mrb[18].mxu1 }
 0x24f   : > { %2263 = vst.msk [vmem:[%s3293_s29 + $0x38] sm:$0xf] %vm415_vm13, %v2299_v16  ;;  %v1355_v49 = vpop.f32.mrb[19].mxu0  ;;  %v2387_v60 = vpop.f32.mrb[19].mxu1 }
 0x250   : > { %2262 = vst [vmem:[%s3293_s29 + $0x30] sm:$0xff] %v2298_v50 }
 0x27a   : > { %v1640_v61 = vpop.f32.mrb[20].mxu1 }
 0x27b   : > { %v1599_v0 = vpop.f32.mrb[20].mxu0  ;;  %v2301_v62 = vpack.c.bf16 %v1640_v61, %v1640_v61  ;;  %v2396_v2 = vpop.f32.mrb[21].mxu1 }
 0x27c   : > { %v1601_v10 = vpop.f32.mrb[21].mxu0  ;;  %v1643_v6 = vpop.f32.mrb[22].mxu1 }
 0x27d   : > { %v2300_v8 = vpack.c.bf16 %v1601_v10, %v1599_v0  ;;  %2271 = vst.msk [vmem:[%s3293_s29 + $0x44] sm:$0xf] %vm415_vm13, %v2301_v62  ;;  %v1603_v3 = vpop.f32.mrb[22].mxu0  ;;  %v2397_v63 = vpop.f32.mrb[23].mxu1 }
 0x27e   : > { %v1604_v9 = vpop.f32.mrb[23].mxu0 }
 0x27f   : > { %2270 = vst [vmem:[%s3293_s29 + $0x3c] sm:$0xff] %v2300_v8 }
 0x2aa   : > { %v1889_v11 = vpop.f32.mrb[24].mxu1 }
 0x2ab   : > { %v1848_v12 = vpop.f32.mrb[24].mxu0  ;;  %v2303_v38 = vpack.c.bf16 %v1889_v11, %v1889_v11  ;;  %v2406_v4 = vpop.f32.mrb[25].mxu1 }
 0x2ac   : > { %v1850_v15 = vpop.f32.mrb[25].mxu0  ;;  %v1892_v24 = vpop.f32.mrb[26].mxu1 }
 0x2ad   : > { %v2302_v29 = vpack.c.bf16 %v1850_v15, %v1848_v12  ;;  %2279 = vst.msk [vmem:[%s3293_s29 + $0x50] sm:$0xf] %vm415_vm13, %v2303_v38  ;;  %v1852_v17 = vpop.f32.mrb[26].mxu0  ;;  %v2407_v59 = vpop.f32.mrb[27].mxu1 }
 0x2ae   : > { %v1853_v20 = vpop.f32.mrb[27].mxu0 }
 0x2af   : > { %2278 = vst [vmem:[%s3293_s29 + $0x48] sm:$0xff] %v2302_v29 }
 0x2da   : > { %v2138_v18 = vpop.f32.mrb[28].mxu1 }
 0x2db   : > { %v2305_v25 = vpack.c.bf16 %v2138_v18, %v2138_v18  ;;  %v2097_v22 = vpop.f32.mrb[28].mxu0  ;;  %v2416_v23 = vpop.f32.mrb[29].mxu1 }
 0x2dc   : > { %v2099_v21 = vpop.f32.mrb[29].mxu0  ;;  %v2141_v31 = vpop.f32.mrb[30].mxu1 }
 0x2dd   : > { %2287 = vst.msk [vmem:[%s3293_s29 + $0x5c] sm:$0xf] %vm415_vm13, %v2305_v25  ;;  %v2304_v7 = vpack.c.bf16 %v2099_v21, %v2097_v22  ;;  %v2101_v56 = vpop.f32.mrb[30].mxu0  ;;  %v2417_v28 = vpop.f32.mrb[31].mxu1 }
 0x2de   : > { %v2102_v32 = vpop.f32.mrb[31].mxu0 }
 0x2df   : > { %2286 = vst [vmem:[%s3293_s29 + $0x54] sm:$0xff] %v2304_v7 }
 0x2e0 PF: > { %s12_s9 = sadd.s32 1, %s2463_s9  }
 0x2e1   : > { %p9_p4 = scmp.ge.s32.totalorder %s12_s9, 4  }
 0x2e3   :  { %11 = sbr.rel (!%p9_p4) target bundleno = 1 (0x1), region = 72 }

</bundles_post_ra>
